<compile_context>
chip_gen: v6e
topology: v6e:2x2x1
jax: 0.10.0
libtpu: 0.0.40
codegen_flags: <defaults>
</compile_context>

<pallas_src>
import numpy as np
import jax
import jax.numpy as jnp
from jax.experimental import pallas as pl
from jax.experimental.pallas import tpu as pltpu

LATENT = 32
CHANNELS = [8, 6, 4]
C0, C1, C2 = CHANNELS
K = 3
PAD = 1
PAD_EFF = (K - 1) - PAD          # effective correlation padding for the deconvs
H = W = 16
OUT_CHANNELS = 4                 # target_shape[0]
BATCH = 2

assert PAD_EFF == 1, "kernel scratch layout assumes 1-row effective padding"


# ----------------------------------------------------------------------------
# Fused Pallas kernel: MLP -> deconv0+SiLU -> deconv1+SiLU -> final 1x1 conv
# ----------------------------------------------------------------------------
def _fused_forward_kernel(x_ref, mlp_w_ref, mlp_b_ref, w0_ref, w1_ref, wf_ref,
                          bias_ref, o_ref, pxf0, pxf1):
    B = x_ref.shape[0]
    f32 = jnp.float32

    # --- Stage 1: MLP (weight columns pre-permuted to fused (h, (w, c)) order)
    y = jnp.dot(x_ref[...], mlp_w_ref[...], preferred_element_type=f32)
    y = y + mlp_b_ref[...]                                   # (B, H*W*C0)

    # --- Stage 2: scatter rows into the H-zero-bordered fused-lane scratch.
    # pxf0[b, 1+h, w*C0+c] = act0[b, h, w, c]; rows 0 and H+1 stay zero.
    zrow0 = jnp.zeros((B, W * C0), f32)
    pxf0[:, 0, :] = zrow0
    pxf0[:, H + 1, :] = zrow0
    for h in range(H):
        pxf0[:, h + 1, :] = y[:, h * (W * C0):(h + 1) * (W * C0)]

    # --- Stage 3: deconv 0 (8->6) as 3 row-matmuls (K=128 deep) + bias + SiLU
    b0 = bias_ref[0:1, 0:W * C1].reshape(1, 1, W * C1)
    acc = jax.lax.dot_general(pxf0[:, 0:H, :], w0_ref[0],
                              (((2,), (0,)), ((), ())),
                              preferred_element_type=f32)
    for kh in range(1, K):
        acc = acc + jax.lax.dot_general(pxf0[:, kh:kh + H, :], w0_ref[kh],
                                        (((2,), (0,)), ((), ())),
                                        preferred_element_type=f32)
    acc = acc + b0
    act1 = acc * jax.nn.sigmoid(acc)                          # SiLU, (B, H, W*C1)

    # --- Stage 4: deconv 1 (6->4), same scheme (K=96 deep)
    zrow1 = jnp.zeros((B, W * C1), f32)
    pxf1[:, 0, :] = zrow1
    pxf1[:, H + 1, :] = zrow1
    pxf1[:, 1:H + 1, :] = act1
    b1 = bias_ref[1:2, 0:W * C2].reshape(1, 1, W * C2)
    acc = jax.lax.dot_general(pxf1[:, 0:H, :], w1_ref[0],
                              (((2,), (0,)), ((), ())),
                              preferred_element_type=f32)
    for kh in range(1, K):
        acc = acc + jax.lax.dot_general(pxf1[:, kh:kh + H, :], w1_ref[kh],
                                        (((2,), (0,)), ((), ())),
                                        preferred_element_type=f32)
    acc = acc + b1
    act2 = acc * jax.nn.sigmoid(acc)                          # (B, H, W*C2)

    # --- Stage 5: final 1x1 conv fused with the NHWC->NCHW relayout.
    # wf_ref maps fused (w, ci) lanes -> fused (co, w) lanes, so each output
    # channel slab is a contiguous 16-lane slice.
    bf = bias_ref[2:3, 0:OUT_CHANNELS * W].reshape(1, 1, OUT_CHANNELS * W)
    out = jax.lax.dot_general(act2, wf_ref[...], (((2,), (0,)), ((), ())),
                              preferred_element_type=f32) + bf
    for co in range(OUT_CHANNELS):
        o_ref[:, co, :, :] = out[:, :, co * W:(co + 1) * W]


def deconv_encoder_forward(params, x):
    B = x.shape[0]
    vmem = pl.BlockSpec(memory_space=pltpu.MemorySpace.VMEM)
    args = (x, params['mlp_w_nhwc'], params['mlp_b_nhwc'],
            params['deconv0_w_big'], params['deconv1_w_big'],
            params['final_w_big'], params['bias_pack'])

    flops = (2 * B * LATENT * C0 * H * W
             + 2 * B * H * K * (W * C0) * (W * C1)
             + 2 * B * H * K * (W * C1) * (W * C2)
             + 2 * B * H * (W * C2) * (OUT_CHANNELS * W))
    transcendentals = B * H * (W * C1 + W * C2)
    bytes_accessed = 4 * (sum(int(np.prod(a.shape)) for a in args)
                          + B * OUT_CHANNELS * H * W)

    return pl.pallas_call(
        _fused_forward_kernel,
        out_shape=jax.ShapeDtypeStruct((B, OUT_CHANNELS, H, W), jnp.float32),
        in_specs=[vmem] * len(args),
        out_specs=vmem,
        scratch_shapes=[
            pltpu.VMEM((B, H + 2 * PAD_EFF, W * C0), jnp.float32),
            pltpu.VMEM((B, H + 2 * PAD_EFF, W * C1), jnp.float32),
        ],
        cost_estimate=pl.CostEstimate(flops=flops,
                                      transcendentals=transcendentals,
                                      bytes_accessed=bytes_accessed),
    )(*args)


# ----------------------------------------------------------------------------
# Parameters: PyTorch-layout tensors + host-side (free) kernel-layout rewrites
# ----------------------------------------------------------------------------
def init_params(key):
    keys = jax.random.split(key, 8)
    p = {}
    # flatten module: MLP(LATENT -> channels[0]*H*W)
    # TODO(synk): vschaos MLP default hidden config approximated as one affine layer.
    dout = C0 * H * W
    p['mlp_wt'] = 0.1 * jax.random.normal(keys[0], (dout, LATENT), jnp.float32)
    p['mlp_bias'] = 0.1 * jax.random.normal(keys[1], (dout,), jnp.float32)

    for li in range(len(CHANNELS) - 1):
        cin, cout = CHANNELS[li], CHANNELS[li + 1]
        p[f'deconv{li}_wt'] = 0.1 * jax.random.normal(
            keys[2 + 2 * li], (cin, cout, K, K), jnp.float32)
        p[f'deconv{li}_bias'] = 0.1 * jax.random.normal(
            keys[3 + 2 * li], (cout,), jnp.float32)

    p['final_wt'] = 0.1 * jax.random.normal(
        keys[6], (OUT_CHANNELS, CHANNELS[-1], 1, 1), jnp.float32)
    p['final_bias'] = 0.1 * jax.random.normal(keys[7], (OUT_CHANNELS,), jnp.float32)

    # ---- host-side derived, kernel-layout parameters (zero runtime cost) ----
    # MLP: permute columns from PyTorch's (c, h, w) flatten order to (h, w, c)
    # so the dense matmul directly emits the fused-lane layout.
    mlp_w = np.asarray(p['mlp_wt']).T                         # (LATENT, C0*H*W)
    mlp_b = np.asarray(p['mlp_bias'])
    perm = np.arange(C0 * H * W).reshape(C0, H, W).transpose(1, 2, 0).reshape(-1)
    p['mlp_w_nhwc'] = jnp.asarray(mlp_w[:, perm])
    p['mlp_b_nhwc'] = jnp.asarray(mlp_b[perm].reshape(1, -1))

    # Transposed conv == correlation with spatially flipped, channel-transposed
    # kernel; fold the W axis (and its zero border) into block-banded
    # (W*Cin, W*Cout) slabs, one per kernel row kh.
    for li in range(len(CHANNELS) - 1):
        cin, cout = CHANNELS[li], CHANNELS[li + 1]
        wt = np.asarray(p[f'deconv{li}_wt'])                  # (cin, cout, K, K)
        w_eff = np.transpose(wt[:, :, ::-1, ::-1], (2, 3, 0, 1))  # (K, K, cin, cout)
        big = np.zeros((K, W * cin, W * cout), np.float32)
        for kh in range(K):
            for wo in range(W):
                for kw in range(K):
                    wi = wo + kw - PAD_EFF
                    if 0 <= wi < W:
                        big[kh, wi * cin:(wi + 1) * cin,
                            wo * cout:(wo + 1) * cout] = w_eff[kh, kw]
        p[f'deconv{li}_w_big'] = jnp.asarray(big)

    # Final 1x1 conv fused with NHWC->NCHW: block matrix mapping fused (w, ci)
    # lanes to fused (co, w) lanes.
    wf = np.asarray(p['final_wt'])[:, :, 0, 0]                # (Cout, C2)
    mall = np.zeros((W * C2, OUT_CHANNELS * W), np.float32)
    for wo in range(W):
        mall[wo * C2:(wo + 1) * C2, wo::W] = wf.T
    p['final_w_big'] = jnp.asarray(mall)

    # All conv biases, pre-tiled to the fused lane layouts, in ONE VMEM block.
    bias_pack = np.zeros((3, 128), np.float32)
    bias_pack[0, :W * C1] = np.tile(np.asarray(p['deconv0_bias']), W)
    bias_pack[1, :W * C2] = np.tile(np.asarray(p['deconv1_bias']), W)
    bias_pack[2, :OUT_CHANNELS * W] = np.repeat(np.asarray(p['final_bias']), W)
    p['bias_pack'] = jnp.asarray(bias_pack)
    return p


# ----------------------------------------------------------------------------
# Pure-JAX NCHW reference (transposed conv from definition) for sanity check
# ----------------------------------------------------------------------------
def _ref_conv_transpose(x, wt, b, k, pad):
    B, cin, h, w = x.shape
    cout = wt.shape[1]
    yf = jnp.zeros((B, cout, h + k - 1, w + k - 1), jnp.float32)
    for kh in range(k):
        for kw in range(k):
            contrib = jnp.einsum('bchw,cd->bdhw', x, wt[:, :, kh, kw])
            yf = yf.at[:, :, kh:kh + h, kw:kw + w].add(contrib)
    ho = h + (k - 1) - 2 * pad
    wo = w + (k - 1) - 2 * pad
    return yf[:, :, pad:pad + ho, pad:pad + wo] + b.reshape(1, -1, 1, 1)


def ref_forward(params, x):
    out = x @ params['mlp_wt'].T + params['mlp_bias']
    B = out.shape[0]
    out = out.reshape(B, C0, H, W)
    for li in range(len(CHANNELS) - 1):
        out = _ref_conv_transpose(out, params[f'deconv{li}_wt'],
                                  params[f'deconv{li}_bias'], K, PAD)
        out = out * jax.nn.sigmoid(out)
    wc = params['final_wt'][:, :, 0, 0]
    out = jnp.einsum('bchw,oc->bohw', out, wc) + params['final_bias'].reshape(1, -1, 1, 1)
    return out


if __name__ == "__main__":
    key = jax.random.PRNGKey(0)
    kp, kx = jax.random.split(key)
    params = init_params(kp)
    x = jax.random.normal(kx, (BATCH, LATENT), jnp.float32)

    out = deconv_encoder_forward(params, x)
    out = jax.block_until_ready(out)

    ref = jax.block_until_ready(ref_forward(params, x))
    assert out.shape == (BATCH, OUT_CHANNELS, H, W), out.shape
    assert np.allclose(np.asarray(out), np.asarray(ref), rtol=1e-4, atol=1e-4), (
        float(np.max(np.abs(np.asarray(out) - np.asarray(ref)))))

    print("KERNEL_OK")
</pallas_src>

<mosaic_0001>
module attributes {stable_mosaic.version = 11 : i64} {
  func.func @_fused_forward_kernel(%arg0: memref<2x32xf32, #tpu.memory_space<vmem>>, %arg1: memref<32x2048xf32, #tpu.memory_space<vmem>>, %arg2: memref<1x2048xf32, #tpu.memory_space<vmem>>, %arg3: memref<3x128x96xf32, #tpu.memory_space<vmem>>, %arg4: memref<3x96x64xf32, #tpu.memory_space<vmem>>, %arg5: memref<64x64xf32, #tpu.memory_space<vmem>>, %arg6: memref<3x128xf32, #tpu.memory_space<vmem>>, %arg7: memref<2x4x16x16xf32, #tpu.memory_space<vmem>>, %arg8: memref<2x18x128xf32, #tpu.memory_space<vmem>>, %arg9: memref<2x18x96xf32, #tpu.memory_space<vmem>>) attributes {dimension_semantics = [], scalar_prefetch = 0 : i64, scratch_operands = 2 : i64, tpu.core_type = #tpu.core_type<tc>} {
    %c0 = arith.constant 0 : index
    %c0_0 = arith.constant 0 : index
    %0 = vector.load %arg0[%c0, %c0_0] : memref<2x32xf32, #tpu.memory_space<vmem>>, vector<2x32xf32>
    %c0_1 = arith.constant 0 : index
    %c0_2 = arith.constant 0 : index
    %1 = vector.load %arg1[%c0_1, %c0_2] : memref<32x2048xf32, #tpu.memory_space<vmem>>, vector<32x2048xf32>
    %cst = arith.constant dense<0.000000e+00> : vector<2x2048xf32>
    %2 = tpu.matmul %0, %1, %cst {dimension_numbers = #tpu.dot_dimension_numbers<[1], [0], [0], [1], [0, 0, 1, 1], [], []>} : vector<2x32xf32>, vector<32x2048xf32>, vector<2x2048xf32> -> vector<2x2048xf32>
    %c0_3 = arith.constant 0 : index
    %c0_4 = arith.constant 0 : index
    %3 = vector.load %arg2[%c0_3, %c0_4] : memref<1x2048xf32, #tpu.memory_space<vmem>>, vector<1x2048xf32>
    %4 = vector.broadcast %3 : vector<1x2048xf32> to vector<2x2048xf32>
    %5 = arith.addf %2, %4 : vector<2x2048xf32>
    %cst_5 = arith.constant 0.000000e+00 : f32
    %6 = vector.broadcast %cst_5 : f32 to vector<2x128xf32>
    %c0_6 = arith.constant 0 : index
    %c0_7 = arith.constant 0 : index
    %c0_8 = arith.constant 0 : index
    %7 = vector.load %arg8[%c0_6, %c0_7, %c0_8] : memref<2x18x128xf32, #tpu.memory_space<vmem>>, vector<2x1x128xf32>
    %8 = vector.shape_cast %7 : vector<2x1x128xf32> to vector<2x128xf32>
    %9 = vector.shape_cast %6 : vector<2x128xf32> to vector<2x1x128xf32>
    tpu.vector_store %arg8[%c0_6, %c0_7, %c0_8], %9 {strides = array<i32>} : memref<2x18x128xf32, #tpu.memory_space<vmem>>, vector<2x1x128xf32>,
    %c0_9 = arith.constant 0 : index
    %c17 = arith.constant 17 : index
    %c0_10 = arith.constant 0 : index
    %10 = vector.load %arg8[%c0_9, %c17, %c0_10] : memref<2x18x128xf32, #tpu.memory_space<vmem>>, vector<2x1x128xf32>
    %11 = vector.shape_cast %10 : vector<2x1x128xf32> to vector<2x128xf32>
    %12 = vector.shape_cast %6 : vector<2x128xf32> to vector<2x1x128xf32>
    tpu.vector_store %arg8[%c0_9, %c17, %c0_10], %12 {strides = array<i32>} : memref<2x18x128xf32, #tpu.memory_space<vmem>>, vector<2x1x128xf32>,
    %13 = vector.extract_strided_slice %5 {offsets = [0, 0], sizes = [2, 128], strides = [1, 1]} : vector<2x2048xf32> to vector<2x128xf32>
    %c0_11 = arith.constant 0 : index
    %c1 = arith.constant 1 : index
    %c0_12 = arith.constant 0 : index
    %14 = vector.load %arg8[%c0_11, %c1, %c0_12] : memref<2x18x128xf32, #tpu.memory_space<vmem>>, vector<2x1x128xf32>
    %15 = vector.shape_cast %14 : vector<2x1x128xf32> to vector<2x128xf32>
    %16 = vector.shape_cast %13 : vector<2x128xf32> to vector<2x1x128xf32>
    tpu.vector_store %arg8[%c0_11, %c1, %c0_12], %16 {strides = array<i32>} : memref<2x18x128xf32, #tpu.memory_space<vmem>>, vector<2x1x128xf32>,
    %17 = vector.extract_strided_slice %5 {offsets = [0, 128], sizes = [2, 128], strides = [1, 1]} : vector<2x2048xf32> to vector<2x128xf32>
    %c0_13 = arith.constant 0 : index
    %c2 = arith.constant 2 : index
    %c0_14 = arith.constant 0 : index
    %18 = vector.load %arg8[%c0_13, %c2, %c0_14] : memref<2x18x128xf32, #tpu.memory_space<vmem>>, vector<2x1x128xf32>
    %19 = vector.shape_cast %18 : vector<2x1x128xf32> to vector<2x128xf32>
    %20 = vector.shape_cast %17 : vector<2x128xf32> to vector<2x1x128xf32>
    tpu.vector_store %arg8[%c0_13, %c2, %c0_14], %20 {strides = array<i32>} : memref<2x18x128xf32, #tpu.memory_space<vmem>>, vector<2x1x128xf32>,
    %21 = vector.extract_strided_slice %5 {offsets = [0, 256], sizes = [2, 128], strides = [1, 1]} : vector<2x2048xf32> to vector<2x128xf32>
    %c0_15 = arith.constant 0 : index
    %c3 = arith.constant 3 : index
    %c0_16 = arith.constant 0 : index
    %22 = vector.load %arg8[%c0_15, %c3, %c0_16] : memref<2x18x128xf32, #tpu.memory_space<vmem>>, vector<2x1x128xf32>
    %23 = vector.shape_cast %22 : vector<2x1x128xf32> to vector<2x128xf32>
    %24 = vector.shape_cast %21 : vector<2x128xf32> to vector<2x1x128xf32>
    tpu.vector_store %arg8[%c0_15, %c3, %c0_16], %24 {strides = array<i32>} : memref<2x18x128xf32, #tpu.memory_space<vmem>>, vector<2x1x128xf32>,
    %25 = vector.extract_strided_slice %5 {offsets = [0, 384], sizes = [2, 128], strides = [1, 1]} : vector<2x2048xf32> to vector<2x128xf32>
    %c0_17 = arith.constant 0 : index
    %c4 = arith.constant 4 : index
    %c0_18 = arith.constant 0 : index
    %26 = vector.load %arg8[%c0_17, %c4, %c0_18] : memref<2x18x128xf32, #tpu.memory_space<vmem>>, vector<2x1x128xf32>
    %27 = vector.shape_cast %26 : vector<2x1x128xf32> to vector<2x128xf32>
    %28 = vector.shape_cast %25 : vector<2x128xf32> to vector<2x1x128xf32>
    tpu.vector_store %arg8[%c0_17, %c4, %c0_18], %28 {strides = array<i32>} : memref<2x18x128xf32, #tpu.memory_space<vmem>>, vector<2x1x128xf32>,
    %29 = vector.extract_strided_slice %5 {offsets = [0, 512], sizes = [2, 128], strides = [1, 1]} : vector<2x2048xf32> to vector<2x128xf32>
    %c0_19 = arith.constant 0 : index
    %c5 = arith.constant 5 : index
    %c0_20 = arith.constant 0 : index
    %30 = vector.load %arg8[%c0_19, %c5, %c0_20] : memref<2x18x128xf32, #tpu.memory_space<vmem>>, vector<2x1x128xf32>
    %31 = vector.shape_cast %30 : vector<2x1x128xf32> to vector<2x128xf32>
    %32 = vector.shape_cast %29 : vector<2x128xf32> to vector<2x1x128xf32>
    tpu.vector_store %arg8[%c0_19, %c5, %c0_20], %32 {strides = array<i32>} : memref<2x18x128xf32, #tpu.memory_space<vmem>>, vector<2x1x128xf32>,
    %33 = vector.extract_strided_slice %5 {offsets = [0, 640], sizes = [2, 128], strides = [1, 1]} : vector<2x2048xf32> to vector<2x128xf32>
    %c0_21 = arith.constant 0 : index
    %c6 = arith.constant 6 : index
    %c0_22 = arith.constant 0 : index
    %34 = vector.load %arg8[%c0_21, %c6, %c0_22] : memref<2x18x128xf32, #tpu.memory_space<vmem>>, vector<2x1x128xf32>
    %35 = vector.shape_cast %34 : vector<2x1x128xf32> to vector<2x128xf32>
    %36 = vector.shape_cast %33 : vector<2x128xf32> to vector<2x1x128xf32>
    tpu.vector_store %arg8[%c0_21, %c6, %c0_22], %36 {strides = array<i32>} : memref<2x18x128xf32, #tpu.memory_space<vmem>>, vector<2x1x128xf32>,
    %37 = vector.extract_strided_slice %5 {offsets = [0, 768], sizes = [2, 128], strides = [1, 1]} : vector<2x2048xf32> to vector<2x128xf32>
    %c0_23 = arith.constant 0 : index
    %c7 = arith.constant 7 : index
    %c0_24 = arith.constant 0 : index
    %38 = vector.load %arg8[%c0_23, %c7, %c0_24] : memref<2x18x128xf32, #tpu.memory_space<vmem>>, vector<2x1x128xf32>
    %39 = vector.shape_cast %38 : vector<2x1x128xf32> to vector<2x128xf32>
    %40 = vector.shape_cast %37 : vector<2x128xf32> to vector<2x1x128xf32>
    tpu.vector_store %arg8[%c0_23, %c7, %c0_24], %40 {strides = array<i32>} : memref<2x18x128xf32, #tpu.memory_space<vmem>>, vector<2x1x128xf32>,
    %41 = vector.extract_strided_slice %5 {offsets = [0, 896], sizes = [2, 128], strides = [1, 1]} : vector<2x2048xf32> to vector<2x128xf32>
    %c0_25 = arith.constant 0 : index
    %c8 = arith.constant 8 : index
    %c0_26 = arith.constant 0 : index
    %42 = vector.load %arg8[%c0_25, %c8, %c0_26] : memref<2x18x128xf32, #tpu.memory_space<vmem>>, vector<2x1x128xf32>
    %43 = vector.shape_cast %42 : vector<2x1x128xf32> to vector<2x128xf32>
    %44 = vector.shape_cast %41 : vector<2x128xf32> to vector<2x1x128xf32>
    tpu.vector_store %arg8[%c0_25, %c8, %c0_26], %44 {strides = array<i32>} : memref<2x18x128xf32, #tpu.memory_space<vmem>>, vector<2x1x128xf32>,
    %45 = vector.extract_strided_slice %5 {offsets = [0, 1024], sizes = [2, 128], strides = [1, 1]} : vector<2x2048xf32> to vector<2x128xf32>
    %c0_27 = arith.constant 0 : index
    %c9 = arith.constant 9 : index
    %c0_28 = arith.constant 0 : index
    %46 = vector.load %arg8[%c0_27, %c9, %c0_28] : memref<2x18x128xf32, #tpu.memory_space<vmem>>, vector<2x1x128xf32>
    %47 = vector.shape_cast %46 : vector<2x1x128xf32> to vector<2x128xf32>
    %48 = vector.shape_cast %45 : vector<2x128xf32> to vector<2x1x128xf32>
    tpu.vector_store %arg8[%c0_27, %c9, %c0_28], %48 {strides = array<i32>} : memref<2x18x128xf32, #tpu.memory_space<vmem>>, vector<2x1x128xf32>,
    %49 = vector.extract_strided_slice %5 {offsets = [0, 1152], sizes = [2, 128], strides = [1, 1]} : vector<2x2048xf32> to vector<2x128xf32>
    %c0_29 = arith.constant 0 : index
    %c10 = arith.constant 10 : index
    %c0_30 = arith.constant 0 : index
    %50 = vector.load %arg8[%c0_29, %c10, %c0_30] : memref<2x18x128xf32, #tpu.memory_space<vmem>>, vector<2x1x128xf32>
    %51 = vector.shape_cast %50 : vector<2x1x128xf32> to vector<2x128xf32>
    %52 = vector.shape_cast %49 : vector<2x128xf32> to vector<2x1x128xf32>
    tpu.vector_store %arg8[%c0_29, %c10, %c0_30], %52 {strides = array<i32>} : memref<2x18x128xf32, #tpu.memory_space<vmem>>, vector<2x1x128xf32>,
    %53 = vector.extract_strided_slice %5 {offsets = [0, 1280], sizes = [2, 128], strides = [1, 1]} : vector<2x2048xf32> to vector<2x128xf32>
    %c0_31 = arith.constant 0 : index
    %c11 = arith.constant 11 : index
    %c0_32 = arith.constant 0 : index
    %54 = vector.load %arg8[%c0_31, %c11, %c0_32] : memref<2x18x128xf32, #tpu.memory_space<vmem>>, vector<2x1x128xf32>
    %55 = vector.shape_cast %54 : vector<2x1x128xf32> to vector<2x128xf32>
    %56 = vector.shape_cast %53 : vector<2x128xf32> to vector<2x1x128xf32>
    tpu.vector_store %arg8[%c0_31, %c11, %c0_32], %56 {strides = array<i32>} : memref<2x18x128xf32, #tpu.memory_space<vmem>>, vector<2x1x128xf32>,
    %57 = vector.extract_strided_slice %5 {offsets = [0, 1408], sizes = [2, 128], strides = [1, 1]} : vector<2x2048xf32> to vector<2x128xf32>
    %c0_33 = arith.constant 0 : index
    %c12 = arith.constant 12 : index
    %c0_34 = arith.constant 0 : index
    %58 = vector.load %arg8[%c0_33, %c12, %c0_34] : memref<2x18x128xf32, #tpu.memory_space<vmem>>, vector<2x1x128xf32>
    %59 = vector.shape_cast %58 : vector<2x1x128xf32> to vector<2x128xf32>
    %60 = vector.shape_cast %57 : vector<2x128xf32> to vector<2x1x128xf32>
    tpu.vector_store %arg8[%c0_33, %c12, %c0_34], %60 {strides = array<i32>} : memref<2x18x128xf32, #tpu.memory_space<vmem>>, vector<2x1x128xf32>,
    %61 = vector.extract_strided_slice %5 {offsets = [0, 1536], sizes = [2, 128], strides = [1, 1]} : vector<2x2048xf32> to vector<2x128xf32>
    %c0_35 = arith.constant 0 : index
    %c13 = arith.constant 13 : index
    %c0_36 = arith.constant 0 : index
    %62 = vector.load %arg8[%c0_35, %c13, %c0_36] : memref<2x18x128xf32, #tpu.memory_space<vmem>>, vector<2x1x128xf32>
    %63 = vector.shape_cast %62 : vector<2x1x128xf32> to vector<2x128xf32>
    %64 = vector.shape_cast %61 : vector<2x128xf32> to vector<2x1x128xf32>
    tpu.vector_store %arg8[%c0_35, %c13, %c0_36], %64 {strides = array<i32>} : memref<2x18x128xf32, #tpu.memory_space<vmem>>, vector<2x1x128xf32>,
    %65 = vector.extract_strided_slice %5 {offsets = [0, 1664], sizes = [2, 128], strides = [1, 1]} : vector<2x2048xf32> to vector<2x128xf32>
    %c0_37 = arith.constant 0 : index
    %c14 = arith.constant 14 : index
    %c0_38 = arith.constant 0 : index
    %66 = vector.load %arg8[%c0_37, %c14, %c0_38] : memref<2x18x128xf32, #tpu.memory_space<vmem>>, vector<2x1x128xf32>
    %67 = vector.shape_cast %66 : vector<2x1x128xf32> to vector<2x128xf32>
    %68 = vector.shape_cast %65 : vector<2x128xf32> to vector<2x1x128xf32>
    tpu.vector_store %arg8[%c0_37, %c14, %c0_38], %68 {strides = array<i32>} : memref<2x18x128xf32, #tpu.memory_space<vmem>>, vector<2x1x128xf32>,
    %69 = vector.extract_strided_slice %5 {offsets = [0, 1792], sizes = [2, 128], strides = [1, 1]} : vector<2x2048xf32> to vector<2x128xf32>
    %c0_39 = arith.constant 0 : index
    %c15 = arith.constant 15 : index
    %c0_40 = arith.constant 0 : index
    %70 = vector.load %arg8[%c0_39, %c15, %c0_40] : memref<2x18x128xf32, #tpu.memory_space<vmem>>, vector<2x1x128xf32>
    %71 = vector.shape_cast %70 : vector<2x1x128xf32> to vector<2x128xf32>
    %72 = vector.shape_cast %69 : vector<2x128xf32> to vector<2x1x128xf32>
    tpu.vector_store %arg8[%c0_39, %c15, %c0_40], %72 {strides = array<i32>} : memref<2x18x128xf32, #tpu.memory_space<vmem>>, vector<2x1x128xf32>,
    %73 = vector.extract_strided_slice %5 {offsets = [0, 1920], sizes = [2, 128], strides = [1, 1]} : vector<2x2048xf32> to vector<2x128xf32>
    %c0_41 = arith.constant 0 : index
    %c16 = arith.constant 16 : index
    %c0_42 = arith.constant 0 : index
    %74 = vector.load %arg8[%c0_41, %c16, %c0_42] : memref<2x18x128xf32, #tpu.memory_space<vmem>>, vector<2x1x128xf32>
    %75 = vector.shape_cast %74 : vector<2x1x128xf32> to vector<2x128xf32>
    %76 = vector.shape_cast %73 : vector<2x128xf32> to vector<2x1x128xf32>
    tpu.vector_store %arg8[%c0_41, %c16, %c0_42], %76 {strides = array<i32>} : memref<2x18x128xf32, #tpu.memory_space<vmem>>, vector<2x1x128xf32>,
    %c0_43 = arith.constant 0 : index
    %c0_44 = arith.constant 0 : index
    %77 = vector.load %arg6[%c0_43, %c0_44] : memref<3x128xf32, #tpu.memory_space<vmem>>, vector<1x96xf32>
    %78 = vector.shape_cast %77 : vector<1x96xf32> to vector<1x1x96xf32>
    %c0_45 = arith.constant 0 : index
    %c0_46 = arith.constant 0 : index
    %c0_47 = arith.constant 0 : index
    %79 = vector.load %arg8[%c0_45, %c0_46, %c0_47] : memref<2x18x128xf32, #tpu.memory_space<vmem>>, vector<2x16x128xf32>
    %c0_48 = arith.constant 0 : index
    %c0_49 = arith.constant 0 : index
    %c0_50 = arith.constant 0 : index
    %80 = vector.load %arg3[%c0_48, %c0_49, %c0_50] : memref<3x128x96xf32, #tpu.memory_space<vmem>>, vector<1x128x96xf32>
    %81 = vector.shape_cast %80 : vector<1x128x96xf32> to vector<128x96xf32>
    %cst_51 = arith.constant dense<0.000000e+00> : vector<2x16x96xf32>
    %82 = tpu.matmul %79, %81, %cst_51 {dimension_numbers = #tpu.dot_dimension_numbers<[2], [0], [0, 1], [1], [0, 0, 0, 1, 1, 1], [], []>} : vector<2x16x128xf32>, vector<128x96xf32>, vector<2x16x96xf32> -> vector<2x16x96xf32>
    %c0_52 = arith.constant 0 : index
    %c1_53 = arith.constant 1 : index
    %c0_54 = arith.constant 0 : index
    %83 = vector.load %arg8[%c0_52, %c1_53, %c0_54] : memref<2x18x128xf32, #tpu.memory_space<vmem>>, vector<2x16x128xf32>
    %c1_55 = arith.constant 1 : index
    %c0_56 = arith.constant 0 : index
    %c0_57 = arith.constant 0 : index
    %84 = vector.load %arg3[%c1_55, %c0_56, %c0_57] : memref<3x128x96xf32, #tpu.memory_space<vmem>>, vector<1x128x96xf32>
    %85 = vector.shape_cast %84 : vector<1x128x96xf32> to vector<128x96xf32>
    %cst_58 = arith.constant dense<0.000000e+00> : vector<2x16x96xf32>
    %86 = tpu.matmul %83, %85, %cst_58 {dimension_numbers = #tpu.dot_dimension_numbers<[2], [0], [0, 1], [1], [0, 0, 0, 1, 1, 1], [], []>} : vector<2x16x128xf32>, vector<128x96xf32>, vector<2x16x96xf32> -> vector<2x16x96xf32>
    %87 = arith.addf %82, %86 : vector<2x16x96xf32>
    %c0_59 = arith.constant 0 : index
    %c2_60 = arith.constant 2 : index
    %c0_61 = arith.constant 0 : index
    %88 = vector.load %arg8[%c0_59, %c2_60, %c0_61] : memref<2x18x128xf32, #tpu.memory_space<vmem>>, vector<2x16x128xf32>
    %c2_62 = arith.constant 2 : index
    %c0_63 = arith.constant 0 : index
    %c0_64 = arith.constant 0 : index
    %89 = vector.load %arg3[%c2_62, %c0_63, %c0_64] : memref<3x128x96xf32, #tpu.memory_space<vmem>>, vector<1x128x96xf32>
    %90 = vector.shape_cast %89 : vector<1x128x96xf32> to vector<128x96xf32>
    %cst_65 = arith.constant dense<0.000000e+00> : vector<2x16x96xf32>
    %91 = tpu.matmul %88, %90, %cst_65 {dimension_numbers = #tpu.dot_dimension_numbers<[2], [0], [0, 1], [1], [0, 0, 0, 1, 1, 1], [], []>} : vector<2x16x128xf32>, vector<128x96xf32>, vector<2x16x96xf32> -> vector<2x16x96xf32>
    %92 = arith.addf %87, %91 : vector<2x16x96xf32>
    %93 = vector.broadcast %78 : vector<1x1x96xf32> to vector<2x16x96xf32>
    %94 = arith.addf %92, %93 : vector<2x16x96xf32>
    %95 = arith.negf %94 : vector<2x16x96xf32>
    %96 = math.exp %95 : vector<2x16x96xf32>
    %cst_66 = arith.constant 1.000000e+00 : f32
    %97 = vector.broadcast %cst_66 : f32 to vector<2x16x96xf32>
    %98 = arith.addf %97, %96 : vector<2x16x96xf32>
    %99 = arith.divf %97, %98 : vector<2x16x96xf32>
    %100 = arith.mulf %94, %99 : vector<2x16x96xf32>
    %cst_67 = arith.constant 0.000000e+00 : f32
    %101 = vector.broadcast %cst_67 : f32 to vector<2x96xf32>
    %c0_68 = arith.constant 0 : index
    %c0_69 = arith.constant 0 : index
    %c0_70 = arith.constant 0 : index
    %102 = vector.load %arg9[%c0_68, %c0_69, %c0_70] : memref<2x18x96xf32, #tpu.memory_space<vmem>>, vector<2x1x96xf32>
    %103 = vector.shape_cast %102 : vector<2x1x96xf32> to vector<2x96xf32>
    %104 = vector.shape_cast %101 : vector<2x96xf32> to vector<2x1x96xf32>
    tpu.vector_store %arg9[%c0_68, %c0_69, %c0_70], %104 {strides = array<i32>} : memref<2x18x96xf32, #tpu.memory_space<vmem>>, vector<2x1x96xf32>,
    %c0_71 = arith.constant 0 : index
    %c17_72 = arith.constant 17 : index
    %c0_73 = arith.constant 0 : index
    %105 = vector.load %arg9[%c0_71, %c17_72, %c0_73] : memref<2x18x96xf32, #tpu.memory_space<vmem>>, vector<2x1x96xf32>
    %106 = vector.shape_cast %105 : vector<2x1x96xf32> to vector<2x96xf32>
    %107 = vector.shape_cast %101 : vector<2x96xf32> to vector<2x1x96xf32>
    tpu.vector_store %arg9[%c0_71, %c17_72, %c0_73], %107 {strides = array<i32>} : memref<2x18x96xf32, #tpu.memory_space<vmem>>, vector<2x1x96xf32>,
    %c0_74 = arith.constant 0 : index
    %c1_75 = arith.constant 1 : index
    %c0_76 = arith.constant 0 : index
    %108 = vector.load %arg9[%c0_74, %c1_75, %c0_76] : memref<2x18x96xf32, #tpu.memory_space<vmem>>, vector<2x16x96xf32>
    tpu.vector_store %arg9[%c0_74, %c1_75, %c0_76], %100 {strides = array<i32>} : memref<2x18x96xf32, #tpu.memory_space<vmem>>, vector<2x16x96xf32>,
    %c1_77 = arith.constant 1 : index
    %c0_78 = arith.constant 0 : index
    %109 = vector.load %arg6[%c1_77, %c0_78] : memref<3x128xf32, #tpu.memory_space<vmem>>, vector<1x64xf32>
    %110 = vector.shape_cast %109 : vector<1x64xf32> to vector<1x1x64xf32>
    %c0_79 = arith.constant 0 : index
    %c0_80 = arith.constant 0 : index
    %c0_81 = arith.constant 0 : index
    %111 = vector.load %arg9[%c0_79, %c0_80, %c0_81] : memref<2x18x96xf32, #tpu.memory_space<vmem>>, vector<2x16x96xf32>
    %c0_82 = arith.constant 0 : index
    %c0_83 = arith.constant 0 : index
    %c0_84 = arith.constant 0 : index
    %112 = vector.load %arg4[%c0_82, %c0_83, %c0_84] : memref<3x96x64xf32, #tpu.memory_space<vmem>>, vector<1x96x64xf32>
    %113 = vector.shape_cast %112 : vector<1x96x64xf32> to vector<96x64xf32>
    %cst_85 = arith.constant dense<0.000000e+00> : vector<2x16x64xf32>
    %114 = tpu.matmul %111, %113, %cst_85 {dimension_numbers = #tpu.dot_dimension_numbers<[2], [0], [0, 1], [1], [0, 0, 0, 1, 1, 1], [], []>} : vector<2x16x96xf32>, vector<96x64xf32>, vector<2x16x64xf32> -> vector<2x16x64xf32>
    %c0_86 = arith.constant 0 : index
    %c1_87 = arith.constant 1 : index
    %c0_88 = arith.constant 0 : index
    %115 = vector.load %arg9[%c0_86, %c1_87, %c0_88] : memref<2x18x96xf32, #tpu.memory_space<vmem>>, vector<2x16x96xf32>
    %c1_89 = arith.constant 1 : index
    %c0_90 = arith.constant 0 : index
    %c0_91 = arith.constant 0 : index
    %116 = vector.load %arg4[%c1_89, %c0_90, %c0_91] : memref<3x96x64xf32, #tpu.memory_space<vmem>>, vector<1x96x64xf32>
    %117 = vector.shape_cast %116 : vector<1x96x64xf32> to vector<96x64xf32>
    %cst_92 = arith.constant dense<0.000000e+00> : vector<2x16x64xf32>
    %118 = tpu.matmul %115, %117, %cst_92 {dimension_numbers = #tpu.dot_dimension_numbers<[2], [0], [0, 1], [1], [0, 0, 0, 1, 1, 1], [], []>} : vector<2x16x96xf32>, vector<96x64xf32>, vector<2x16x64xf32> -> vector<2x16x64xf32>
    %119 = arith.addf %114, %118 : vector<2x16x64xf32>
    %c0_93 = arith.constant 0 : index
    %c2_94 = arith.constant 2 : index
    %c0_95 = arith.constant 0 : index
    %120 = vector.load %arg9[%c0_93, %c2_94, %c0_95] : memref<2x18x96xf32, #tpu.memory_space<vmem>>, vector<2x16x96xf32>
    %c2_96 = arith.constant 2 : index
    %c0_97 = arith.constant 0 : index
    %c0_98 = arith.constant 0 : index
    %121 = vector.load %arg4[%c2_96, %c0_97, %c0_98] : memref<3x96x64xf32, #tpu.memory_space<vmem>>, vector<1x96x64xf32>
    %122 = vector.shape_cast %121 : vector<1x96x64xf32> to vector<96x64xf32>
    %cst_99 = arith.constant dense<0.000000e+00> : vector<2x16x64xf32>
    %123 = tpu.matmul %120, %122, %cst_99 {dimension_numbers = #tpu.dot_dimension_numbers<[2], [0], [0, 1], [1], [0, 0, 0, 1, 1, 1], [], []>} : vector<2x16x96xf32>, vector<96x64xf32>, vector<2x16x64xf32> -> vector<2x16x64xf32>
    %124 = arith.addf %119, %123 : vector<2x16x64xf32>
    %125 = vector.broadcast %110 : vector<1x1x64xf32> to vector<2x16x64xf32>
    %126 = arith.addf %124, %125 : vector<2x16x64xf32>
    %127 = arith.negf %126 : vector<2x16x64xf32>
    %128 = math.exp %127 : vector<2x16x64xf32>
    %cst_100 = arith.constant 1.000000e+00 : f32
    %129 = vector.broadcast %cst_100 : f32 to vector<2x16x64xf32>
    %130 = arith.addf %129, %128 : vector<2x16x64xf32>
    %131 = arith.divf %129, %130 : vector<2x16x64xf32>
    %132 = arith.mulf %126, %131 : vector<2x16x64xf32>
    %c2_101 = arith.constant 2 : index
    %c0_102 = arith.constant 0 : index
    %133 = vector.load %arg6[%c2_101, %c0_102] : memref<3x128xf32, #tpu.memory_space<vmem>>, vector<1x64xf32>
    %134 = vector.shape_cast %133 : vector<1x64xf32> to vector<1x1x64xf32>
    %c0_103 = arith.constant 0 : index
    %c0_104 = arith.constant 0 : index
    %135 = vector.load %arg5[%c0_103, %c0_104] : memref<64x64xf32, #tpu.memory_space<vmem>>, vector<64x64xf32>
    %cst_105 = arith.constant dense<0.000000e+00> : vector<2x16x64xf32>
    %136 = tpu.matmul %132, %135, %cst_105 {dimension_numbers = #tpu.dot_dimension_numbers<[2], [0], [0, 1], [1], [0, 0, 0, 1, 1, 1], [], []>} : vector<2x16x64xf32>, vector<64x64xf32>, vector<2x16x64xf32> -> vector<2x16x64xf32>
    %137 = vector.broadcast %134 : vector<1x1x64xf32> to vector<2x16x64xf32>
    %138 = arith.addf %136, %137 : vector<2x16x64xf32>
    %139 = vector.extract_strided_slice %138 {offsets = [0, 0, 0], sizes = [2, 16, 16], strides = [1, 1, 1]} : vector<2x16x64xf32> to vector<2x16x16xf32>
    %c0_106 = arith.constant 0 : index
    %c0_107 = arith.constant 0 : index
    %c0_108 = arith.constant 0 : index
    %c0_109 = arith.constant 0 : index
    %140 = vector.load %arg7[%c0_106, %c0_107, %c0_108, %c0_109] : memref<2x4x16x16xf32, #tpu.memory_space<vmem>>, vector<2x1x16x16xf32>
    %141 = vector.shape_cast %140 : vector<2x1x16x16xf32> to vector<2x16x16xf32>
    %142 = vector.shape_cast %139 : vector<2x16x16xf32> to vector<2x1x16x16xf32>
    tpu.vector_store %arg7[%c0_106, %c0_107, %c0_108, %c0_109], %142 {strides = array<i32>} : memref<2x4x16x16xf32, #tpu.memory_space<vmem>>, vector<2x1x16x16xf32>,
    %143 = vector.extract_strided_slice %138 {offsets = [0, 0, 16], sizes = [2, 16, 16], strides = [1, 1, 1]} : vector<2x16x64xf32> to vector<2x16x16xf32>
    %c0_110 = arith.constant 0 : index
    %c1_111 = arith.constant 1 : index
    %c0_112 = arith.constant 0 : index
    %c0_113 = arith.constant 0 : index
    %144 = vector.load %arg7[%c0_110, %c1_111, %c0_112, %c0_113] : memref<2x4x16x16xf32, #tpu.memory_space<vmem>>, vector<2x1x16x16xf32>
    %145 = vector.shape_cast %144 : vector<2x1x16x16xf32> to vector<2x16x16xf32>
    %146 = vector.shape_cast %143 : vector<2x16x16xf32> to vector<2x1x16x16xf32>
    tpu.vector_store %arg7[%c0_110, %c1_111, %c0_112, %c0_113], %146 {strides = array<i32>} : memref<2x4x16x16xf32, #tpu.memory_space<vmem>>, vector<2x1x16x16xf32>,
    %147 = vector.extract_strided_slice %138 {offsets = [0, 0, 32], sizes = [2, 16, 16], strides = [1, 1, 1]} : vector<2x16x64xf32> to vector<2x16x16xf32>
    %c0_114 = arith.constant 0 : index
    %c2_115 = arith.constant 2 : index
    %c0_116 = arith.constant 0 : index
    %c0_117 = arith.constant 0 : index
    %148 = vector.load %arg7[%c0_114, %c2_115, %c0_116, %c0_117] : memref<2x4x16x16xf32, #tpu.memory_space<vmem>>, vector<2x1x16x16xf32>
    %149 = vector.shape_cast %148 : vector<2x1x16x16xf32> to vector<2x16x16xf32>
    %150 = vector.shape_cast %147 : vector<2x16x16xf32> to vector<2x1x16x16xf32>
    tpu.vector_store %arg7[%c0_114, %c2_115, %c0_116, %c0_117], %150 {strides = array<i32>} : memref<2x4x16x16xf32, #tpu.memory_space<vmem>>, vector<2x1x16x16xf32>,
    %151 = vector.extract_strided_slice %138 {offsets = [0, 0, 48], sizes = [2, 16, 16], strides = [1, 1, 1]} : vector<2x16x64xf32> to vector<2x16x16xf32>
    %c0_118 = arith.constant 0 : index
    %c3_119 = arith.constant 3 : index
    %c0_120 = arith.constant 0 : index
    %c0_121 = arith.constant 0 : index
    %152 = vector.load %arg7[%c0_118, %c3_119, %c0_120, %c0_121] : memref<2x4x16x16xf32, #tpu.memory_space<vmem>>, vector<2x1x16x16xf32>
    %153 = vector.shape_cast %152 : vector<2x1x16x16xf32> to vector<2x16x16xf32>
    %154 = vector.shape_cast %151 : vector<2x16x16xf32> to vector<2x1x16x16xf32>
    tpu.vector_store %arg7[%c0_118, %c3_119, %c0_120, %c0_121], %154 {strides = array<i32>} : memref<2x4x16x16xf32, #tpu.memory_space<vmem>>, vector<2x1x16x16xf32>,
    return
  }
}

</mosaic_0001>

<bundles_post_ra>
// kernel: tpu_custom_call.1
= control target key start
LH: loop header
LB: loop body
LE: loop exit
PB: predicated region body
PF: predicated region fallthrough
CT: control target
= control target key end

     0   :  { %v2652_v6 = vmov 0.0   ;;  %vm176_vm0 = vcmask 261120   ;;  %s3324_s0 = inlined_call_operand.vmem [shape: f32[2,32], index: 0, kind: input, shape index: {}]   ;;  %s3325_s1 = inlined_call_operand.vmem [shape: f32[32,2048], index: 1, kind: input, shape index: {}]   ;;  %s3326_s2 = inlined_call_operand.vmem [shape: f32[1,2048], index: 2, kind: input, shape index: {}]   ;;  %s3327_s3 = inlined_call_operand.vmem [shape: f32[3,128,96], index: 3, kind: input, shape index: {}]   ;;  %s3328_s4 = inlined_call_operand.vmem [shape: f32[3,96,64], index: 4, kind: input, shape index: {}]   ;;  %s3329_s5 = inlined_call_operand.vmem [shape: f32[64,64], index: 5, kind: input, shape index: {}]   ;;  %s3330_s6 = inlined_call_operand.vmem [shape: f32[3,128], index: 6, kind: input, shape index: {}]   ;;  %s3331_s7 = inlined_call_operand.hbm [shape: f32[2,4,16,16], index: 7, kind: output, shape index: {}]  }
   0x1   :  { %v77_v0 = vld [vmem:[%s3325_s1 + $0x188] sm:$0xff]  ;;  %v79_v1 = vld [vmem:[%s3325_s1 + $0x198] sm:$0xff]  ;;  %v76_v2 = vld [vmem:[%s3325_s1 + $0x180] sm:$0xff]  ;;  %748 = vst [vmem:[#allocation2] sm:$0x1] %v2652_v6  ;;  %244 = vmatprep.mubr.f32.mxu0 %v2652_v6  ;;  %315 = vmatprep.mubr.f32.mxu1 %v2652_v6 }
   0x2   :  { %204 = vmatprep.subr.mxu0 %v77_v0  ;;  %275 = vmatprep.subr.mxu1 %v79_v1  ;;  %v78_v3 = vld [vmem:[%s3325_s1 + $0x190] sm:$0xff]  ;;  %v61_v4 = vld [vmem:[%s3325_s1 + $0x108] sm:$0xff]  ;;  %v63_v5 = vld [vmem:[%s3325_s1 + $0x118] sm:$0xff]  ;;  %749 = vst [vmem:[#allocation2 + $0x18] sm:$0x1] %v2652_v6 }
   0x3   :  { %750 = vst [vmem:[#allocation2 + $0x11] sm:$0x1] %v2652_v6  ;;  %751 = vst [vmem:[#allocation2 + $0x29] sm:$0x1] %v2652_v6  ;;  %205 = vmatpush1.msra.mxu0 %v76_v2  ;;  %276 = vmatpush1.msra.mxu1 %v78_v3  ;;  %v60_v7 = vld [vmem:[%s3325_s1 + $0x100] sm:$0xff]  ;;  %v62_v8 = vld [vmem:[%s3325_s1 + $0x110] sm:$0xff] }
   0x4   :  { %v45_v9 = vld [vmem:[%s3325_s1 + $0x88] sm:$0xff]  ;;  %206 = vmatprep.subr.mxu0 %v61_v4  ;;  %277 = vmatprep.subr.mxu1 %v63_v5  ;;  %v47_v10 = vld [vmem:[%s3325_s1 + $0x98] sm:$0xff]  ;;  %v44_v11 = vld [vmem:[%s3325_s1 + $0x80] sm:$0xff] }
   0x5   :  { %v46_v12 = vld [vmem:[%s3325_s1 + $0x90] sm:$0xff]  ;;  %207 = vmatpush1.msra.mxu0 %v60_v7  ;;  %278 = vmatpush1.msra.mxu1 %v62_v8  ;;  %v29_v13 = vld [vmem:[%s3325_s1 + $0x8] sm:$0xff]  ;;  %v31_v14 = vld [vmem:[%s3325_s1 + $0x18] sm:$0xff] }
   0x6   :  { %208 = vmatprep.subr.mxu0 %v45_v9  ;;  %279 = vmatprep.subr.mxu1 %v47_v10  ;;  %v28_v15 = vld [vmem:[%s3325_s1] sm:$0xff]  ;;  %v30_v16 = vld [vmem:[%s3325_s1 + $0x10] sm:$0xff]  ;;  %v81_v18 = vld [vmem:[%s3325_s1 + $0x1a8] sm:$0xff] }
   0x7   :  { %209 = vmatpush1.msra.mxu0 %v44_v11  ;;  %280 = vmatpush1.msra.mxu1 %v46_v12  ;;  %v2755_v17 = vld [vmem:[%s3324_s0] sm:$0x3]  ;;  %v83_v19 = vld [vmem:[%s3325_s1 + $0x1b8] sm:$0xff]  ;;  %v82_v21 = vld [vmem:[%s3325_s1 + $0x1b0] sm:$0xff] }
   0x8   :  { %210 = vmatprep.subr.mxu0 %v29_v13  ;;  %281 = vmatprep.subr.mxu1 %v31_v14  ;;  %v80_v20 = vld [vmem:[%s3325_s1 + $0x1a0] sm:$0xff]  ;;  %v65_v22 = vld [vmem:[%s3325_s1 + $0x128] sm:$0xff]  ;;  %v67_v23 = vld [vmem:[%s3325_s1 + $0x138] sm:$0xff] }
   0x9   :  { %211 = vmatpush1.msra.mxu0 %v28_v15  ;;  %282 = vmatpush1.msra.mxu1 %v30_v16  ;;  %v64_v24 = vld [vmem:[%s3325_s1 + $0x120] sm:$0xff]  ;;  %v66_v25 = vld [vmem:[%s3325_s1 + $0x130] sm:$0xff]  ;;  %v49_v26 = vld [vmem:[%s3325_s1 + $0xa8] sm:$0xff] }
   0xa   :  { %2121 = vmatmul.mubr.msk.f32.vlgmr.msra.gmra.mxu0 %vm176_vm0, %v2755_v17  ;;  %2122 = vmatmul.mubr.msk.f32.vlgmr.msra.gmra.mxu1 %vm176_vm0, %v2755_v17  ;;  %v51_v27 = vld [vmem:[%s3325_s1 + $0xb8] sm:$0xff]  ;;  %v48_v28 = vld [vmem:[%s3325_s1 + $0xa0] sm:$0xff]  ;;  %v50_v29 = vld [vmem:[%s3325_s1 + $0xb0] sm:$0xff] }
   0xb   :  { %346 = vmatprep.subr.mxu0 %v81_v18  ;;  %417 = vmatprep.subr.mxu1 %v83_v19  ;;  %v33_v30 = vld [vmem:[%s3325_s1 + $0x28] sm:$0xff]  ;;  %v35_v31 = vld [vmem:[%s3325_s1 + $0x38] sm:$0xff]  ;;  %v32_v32 = vld [vmem:[%s3325_s1 + $0x20] sm:$0xff] }
   0xc   :  { %347 = vmatpush1.msra.mxu0 %v80_v20  ;;  %418 = vmatpush1.msra.mxu1 %v82_v21  ;;  %v34_v33 = vld [vmem:[%s3325_s1 + $0x30] sm:$0xff]  ;;  %v85_v34 = vld [vmem:[%s3325_s1 + $0x1c8] sm:$0xff]  ;;  %v87_v35 = vld [vmem:[%s3325_s1 + $0x1d8] sm:$0xff] }
   0xd   :  { %348 = vmatprep.subr.mxu0 %v65_v22  ;;  %419 = vmatprep.subr.mxu1 %v67_v23  ;;  %v84_v36 = vld [vmem:[%s3325_s1 + $0x1c0] sm:$0xff]  ;;  %v86_v37 = vld [vmem:[%s3325_s1 + $0x1d0] sm:$0xff]  ;;  %v69_v38 = vld [vmem:[%s3325_s1 + $0x148] sm:$0xff] }
   0xe   :  { %349 = vmatpush1.msra.mxu0 %v64_v24  ;;  %420 = vmatpush1.msra.mxu1 %v66_v25  ;;  %v71_v39 = vld [vmem:[%s3325_s1 + $0x158] sm:$0xff]  ;;  %v68_v40 = vld [vmem:[%s3325_s1 + $0x140] sm:$0xff]  ;;  %v70_v41 = vld [vmem:[%s3325_s1 + $0x150] sm:$0xff] }
   0xf   :  { %350 = vmatprep.subr.mxu0 %v49_v26  ;;  %421 = vmatprep.subr.mxu1 %v51_v27  ;;  %v53_v42 = vld [vmem:[%s3325_s1 + $0xc8] sm:$0xff]  ;;  %v55_v43 = vld [vmem:[%s3325_s1 + $0xd8] sm:$0xff] }
  0x10   :  { %351 = vmatpush1.msra.mxu0 %v48_v28  ;;  %422 = vmatpush1.msra.mxu1 %v50_v29 }
  0x11   :  { %352 = vmatprep.subr.mxu0 %v33_v30  ;;  %423 = vmatprep.subr.mxu1 %v35_v31 }
  0x12   :  { %353 = vmatpush1.msra.mxu0 %v32_v32  ;;  %386 = vmatprep.mubr.f32.mxu0 %v2652_v6 }
  0x13   :  { %424 = vmatpush1.msra.mxu1 %v34_v33  ;;  %457 = vmatprep.mubr.f32.mxu1 %v2652_v6 }
  0x14   :  { %2123 = vmatmul.mubr.msk.f32.vlgmr.msra.gmra.mxu0 %vm176_vm0, %v2755_v17  ;;  %2124 = vmatmul.mubr.msk.f32.vlgmr.msra.gmra.mxu1 %vm176_vm0, %v2755_v17 }
  0x15   :  { %488 = vmatprep.subr.mxu0 %v85_v34  ;;  %559 = vmatprep.subr.mxu1 %v87_v35 }
  0x16   :  { %489 = vmatpush1.msra.mxu0 %v84_v36  ;;  %560 = vmatpush1.msra.mxu1 %v86_v37 }
  0x17   :  { %12 = vsyncpa [#allocation5], 0  ;;  %490 = vmatprep.subr.mxu0 %v69_v38  ;;  %561 = vmatprep.subr.mxu1 %v71_v39  ;;  %v52_v44 = vld [vmem:[%s3325_s1 + $0xc0] sm:$0xff]  ;;  %v54_v45 = vld [vmem:[%s3325_s1 + $0xd0] sm:$0xff]  ;;  %v96_v36 = vlaneseq  ;;  %v2653_v38 = vmov 1966171168  }
  0x18   :  { %491 = vmatpush1.msra.mxu0 %v68_v40  ;;  %562 = vmatpush1.msra.mxu1 %v70_v41  ;;  %v37_v46 = vld [vmem:[%s3325_s1 + $0x48] sm:$0xff]  ;;  %v39_v47 = vld [vmem:[%s3325_s1 + $0x58] sm:$0xff]  ;;  %v36_v48 = vld [vmem:[%s3325_s1 + $0x40] sm:$0xff]  ;;  %v754_v39 = vunpack.c.l.s4 %v2653_v38  ;;  %vm1542_vm1 = vcmask 778240   ;;  %vm1547_vm2 = vcmask 785408   ;;  %vm1947_vm3 = vcmask 523264  }
  0x19   :  { %492 = vmatprep.subr.mxu0 %v53_v42  ;;  %563 = vmatprep.subr.mxu1 %v55_v43  ;;  %v38_v49 = vld [vmem:[%s3325_s1 + $0x50] sm:$0xff]  ;;  %v89_v50 = vld [vmem:[%s3325_s1 + $0x1e8] sm:$0xff]  ;;  %v91_v51 = vld [vmem:[%s3325_s1 + $0x1f8] sm:$0xff]  ;;  %v3027_v37 = vshrl.u32 %v96_v36, 7  ;;  %1545 = vst.msk [vmem:[#allocation3 + $0x11] sm:$0x1] %vm1542_vm1, %v2652_v6 }
  0x1a   :  { %493 = vmatpush1.msra.mxu0 %v52_v44  ;;  %564 = vmatpush1.msra.mxu1 %v54_v45  ;;  %v88_v52 = vld [vmem:[%s3325_s1 + $0x1e0] sm:$0xff]  ;;  %v90_v53 = vld [vmem:[%s3325_s1 + $0x1f0] sm:$0xff]  ;;  %v73_v54 = vld [vmem:[%s3325_s1 + $0x168] sm:$0xff]  ;;  %v755_v43 = vunpack.c.0.s8 %v754_v39  ;;  %1543 = vst.msk [vmem:[#allocation3] sm:$0x1] %vm1542_vm1, %v2652_v6  ;;  %vm2045_vm4 = vcmask 130048  }
  0x1b   :  { %494 = vmatprep.subr.mxu0 %v37_v46  ;;  %565 = vmatprep.subr.mxu1 %v39_v47  ;;  %v75_v55 = vld [vmem:[%s3325_s1 + $0x178] sm:$0xff]  ;;  %v72_v56 = vld [vmem:[%s3325_s1 + $0x160] sm:$0xff]  ;;  %v74_v57 = vld [vmem:[%s3325_s1 + $0x170] sm:$0xff]  ;;  %v98_v40 = vsub.s32 0, %v3027_v37  ;;  %v106_v41 = vsub.s32 2, %v3027_v37  ;;  %v102_v44 = vsub.s32 1, %v3027_v37 }
  0x1c   :  { %495 = vmatpush1.msra.mxu0 %v36_v48  ;;  %528 = vmatprep.mubr.f32.mxu0 %v2652_v6  ;;  %v57_v58 = vld [vmem:[%s3325_s1 + $0xe8] sm:$0xff]  ;;  %v59_v59 = vld [vmem:[%s3325_s1 + $0xf8] sm:$0xff]  ;;  %v56_v60 = vld [vmem:[%s3325_s1 + $0xe0] sm:$0xff]  ;;  %v110_v45 = vsub.s32 3, %v3027_v37  ;;  %v3041_v48 = vsub.s32 %v755_v43, %v3027_v37  ;;  %1544 = vst.msk [vmem:[#allocation3 + $0x18] sm:$0x1] %vm1542_vm1, %v2652_v6 }
  0x1d   :  { %566 = vmatpush1.msra.mxu1 %v38_v49  ;;  %599 = vmatprep.mubr.f32.mxu1 %v2652_v6  ;;  %v58_v61 = vld [vmem:[%s3325_s1 + $0xf0] sm:$0xff]  ;;  %v41_v62 = vld [vmem:[%s3325_s1 + $0x68] sm:$0xff]  ;;  %v43_v63 = vld [vmem:[%s3325_s1 + $0x78] sm:$0xff]  ;;  %1546 = vst.msk [vmem:[#allocation3 + $0x29] sm:$0x1] %vm1542_vm1, %v2652_v6  ;;  %s2654_s18 = smov 96  }
  0x1e   :  { %2125 = vmatmul.mubr.msk.f32.vlgmr.msra.gmra.mxu0 %vm176_vm0, %v2755_v17  ;;  %2126 = vmatmul.mubr.msk.f32.vlgmr.msra.gmra.mxu1 %vm176_vm0, %v2755_v17  ;;  %v40_v0 = vld [vmem:[%s3325_s1 + $0x60] sm:$0xff]  ;;  %v42_v1 = vld [vmem:[%s3325_s1 + $0x70] sm:$0xff]  ;;  %v2176_v2 = vld [vmem:[%s3327_s3 + $0xf8] sm:$0xff]  ;;  %s2655_s19 = smov 112   ;;  %s2657_s20 = smov [#allocation4]  }
  0x1f   :  { %630 = vmatprep.subr.mxu0 %v89_v50  ;;  %701 = vmatprep.subr.mxu1 %v91_v51  ;;  %v1204_v3 = vld [vmem:[%s3327_s3 + $0x78] sm:$0xff]  ;;  %v2175_v4 = vld [vmem:[%s3327_s3 + $0xf0] sm:$0xff]  ;;  %v2174_v7 = vld [vmem:[%s3327_s3 + $0xe8] sm:$0xff]  ;;  %s2110_s21 = sshll.u32 %s2657_s20, 4  ;;  %s2111_s21 = int_to_ptr.vmem [resolvable:$true] %s2110_s21 }
  0x20   :  { %631 = vmatpush1.msra.mxu0 %v88_v52  ;;  %702 = vmatpush1.msra.mxu1 %v90_v53  ;;  %v1203_v5 = vld [vmem:[%s3327_s3 + $0x70] sm:$0xff]  ;;  %v1202_v8 = vld [vmem:[%s3327_s3 + $0x68] sm:$0xff]  ;;  %v2173_v9 = vld [vmem:[%s3327_s3 + $0xe0] sm:$0xff]  ;;  %s2630_s22 = scalar_lea.vmem %s2111_s21, 2048  ;;  %p2635_p1 = scmp.lt.s32.totalorder %s2111_s21, %s2111_s21 }
  0x21   :  { %632 = vmatprep.subr.mxu0 %v73_v54  ;;  %703 = vmatprep.subr.mxu1 %v75_v55  ;;  %v1201_v10 = vld [vmem:[%s3327_s3 + $0x60] sm:$0xff]  ;;  %v2172_v11 = vld [vmem:[%s3327_s3 + $0xd8] sm:$0xff]  ;;  %v2171_v13 = vld [vmem:[%s3327_s3 + $0xd0] sm:$0xff]  ;;  %p2631_p0 = scmp.ne.s32.totalorder %s2111_s21, %s2630_s22  ;;  %p2636_p2 = scmp.lt.s32.totalorder %s2630_s22, %s2630_s22 }
  0x22   :  { %633 = vmatpush1.msra.mxu0 %v72_v56  ;;  %704 = vmatpush1.msra.mxu1 %v74_v57  ;;  %v1200_v12 = vld [vmem:[%s3327_s3 + $0x58] sm:$0xff]  ;;  %v1199_v14 = vld [vmem:[%s3327_s3 + $0x50] sm:$0xff]  ;;  %v2170_v15 = vld [vmem:[%s3327_s3 + $0xc8] sm:$0xff]  ;;  %v114_v57 = vsub.s32 4, %v3027_v37 }
  0x23   :  { %634 = vmatprep.subr.mxu0 %v57_v58  ;;  %705 = vmatprep.subr.mxu1 %v59_v59  ;;  %v1198_v16 = vld [vmem:[%s3327_s3 + $0x48] sm:$0xff]  ;;  %v1197_v18 = vld [vmem:[%s3327_s3 + $0x40] sm:$0xff]  ;;  %v2168_v19 = vld [vmem:[%s3327_s3 + $0xb8] sm:$0xff]  ;;  %v122_v58 = vsub.s32 6, %v3027_v37  ;;  %p2637_p3 = por %p2636_p2, %p2635_p1 }
  0x24   :  { %635 = vmatpush1.msra.mxu0 %v56_v60  ;;  %706 = vmatpush1.msra.mxu1 %v58_v61  ;;  %v1196_v20 = vld [vmem:[%s3327_s3 + $0x38] sm:$0xff]  ;;  %v2167_v21 = vld [vmem:[%s3327_s3 + $0xb0] sm:$0xff]  ;;  %v2166_v23 = vld [vmem:[%s3327_s3 + $0xa8] sm:$0xff] }
  0x25   :  { %636 = vmatprep.subr.mxu0 %v41_v62  ;;  %707 = vmatprep.subr.mxu1 %v43_v63  ;;  %v1195_v22 = vld [vmem:[%s3327_s3 + $0x30] sm:$0xff]  ;;  %v1194_v24 = vld [vmem:[%s3327_s3 + $0x28] sm:$0xff]  ;;  %v2165_v25 = vld [vmem:[%s3327_s3 + $0xa0] sm:$0xff]  ;;  %v118_v63 = vsub.s32 5, %v3027_v37  ;;  %p2638_p4 = pnand %p2637_p3, %p2631_p0 }
  0x26   :  { %637 = vmatpush1.msra.mxu0 %v40_v0  ;;  %670 = vmatprep.mubr.f32.mxu0 %v2652_v6  ;;  %v1193_v26 = vld [vmem:[%s3327_s3 + $0x20] sm:$0xff]  ;;  %v2164_v27 = vld [vmem:[%s3327_s3 + $0x98] sm:$0xff]  ;;  %v2163_v29 = vld [vmem:[%s3327_s3 + $0x90] sm:$0xff]  ;;  %v126_v0 = vsub.s32 7, %v3027_v37 }
  0x27   :  { %708 = vmatpush1.msra.mxu1 %v42_v1  ;;  %741 = vmatprep.mubr.f32.mxu1 %v2652_v6  ;;  %v1192_v28 = vld [vmem:[%s3327_s3 + $0x18] sm:$0xff]  ;;  %v1191_v30 = vld [vmem:[%s3327_s3 + $0x10] sm:$0xff]  ;;  %v2162_v31 = vld [vmem:[%s3327_s3 + $0x88] sm:$0xff] }
  0x28   :  { %2127 = vmatmul.mubr.msk.f32.vlgmr.msra.gmra.mxu0 %vm176_vm0, %v2755_v17  ;;  %2128 = vmatmul.mubr.msk.f32.vlgmr.msra.gmra.mxu1 %vm176_vm0, %v2755_v17  ;;  %v2169_v17 = vld [vmem:[%s3327_s3 + $0xc0] sm:$0xff]  ;;  %v1190_v32 = vld [vmem:[%s3327_s3 + $0x8] sm:$0xff]  ;;  %v3024_v35 = vld [vmem:[%s3327_s3 + $0x178] sm:$0xff] }
  0x29   :  { %2364 = vmatprep.subr.mxu0 %v2176_v2  ;;  %2402 = vmatprep.subr.mxu1 %v1204_v3  ;;  %v2161_v33 = vld [vmem:[%s3327_s3 + $0x80] sm:$0xff]  ;;  %v2199_v6 = vld [vmem:[%s3328_s4 + $0x68] sm:$0xff] }
  0x2a   :  { %2365 = vmatpush3.msra.mxu0 %v2176_v2  ;;  %2403 = vmatpush3.msra.mxu1 %v1204_v3  ;;  %v1189_v34 = vld [vmem:[%s3327_s3] sm:$0xff] }
  0x2b   :  { %2366 = vmatprep.subr.mxu0 %v2175_v4  ;;  %2404 = vmatprep.subr.mxu1 %v1203_v5  ;;  %v92_v42 = vld [vmem:[%s3326_s2] sm:$0xff] }
  0x2c   :  { %2367 = vmatpush3.msra.mxu0 %v2175_v4  ;;  %2405 = vmatpush3.msra.mxu1 %v1203_v5  ;;  %v99_v46 = vrot.slane %v92_v42, %v98_v40  ;;  %v107_v47 = vrot.slane %v92_v42, %v106_v41  ;;  %v103_v49 = vrot.slane %v92_v42, %v102_v44 }
  0x2d   :  { %2368 = vmatprep.subr.mxu0 %v2174_v7  ;;  %2406 = vmatprep.subr.mxu1 %v1202_v8  ;;  %v111_v50 = vrot.slane %v92_v42, %v110_v45 }
  0x2e   :  { %2369 = vmatpush3.msra.mxu0 %v2174_v7  ;;  %2407 = vmatpush3.msra.mxu1 %v1202_v8  ;;  %v115_v8 = vrot.slane %v92_v42, %v114_v57 }
  0x2f   :  { %2370 = vmatprep.subr.mxu0 %v2173_v9  ;;  %2408 = vmatprep.subr.mxu1 %v1201_v10 }
  0x30   :  { %2371 = vmatpush3.msra.mxu0 %v2173_v9  ;;  %2409 = vmatpush3.msra.mxu1 %v1201_v10  ;;  %v123_v9 = vrot.slane %v92_v42, %v122_v58  ;;  %v119_v10 = vrot.slane %v92_v42, %v118_v63 }
  0x31   :  { %2372 = vmatprep.subr.mxu0 %v2172_v11  ;;  %2410 = vmatprep.subr.mxu1 %v1200_v12 }
  0x32   :  { %2373 = vmatpush3.msra.mxu0 %v2172_v11  ;;  %2411 = vmatpush3.msra.mxu1 %v1200_v12  ;;  %v127_v11 = vrot.slane %v92_v42, %v126_v0 }
  0x33   :  { %2374 = vmatprep.subr.mxu0 %v2171_v13  ;;  %2412 = vmatprep.subr.mxu1 %v1199_v14 }
  0x34   :  { %2375 = vmatpush3.msra.mxu0 %v2171_v13  ;;  %2413 = vmatpush3.msra.mxu1 %v1199_v14 }
  0x35   :  { %2376 = vmatprep.subr.mxu0 %v2170_v15  ;;  %2414 = vmatprep.subr.mxu1 %v1198_v16 }
  0x36   :  { %2377 = vmatpush3.msra.mxu0 %v2170_v15  ;;  %2415 = vmatpush3.msra.mxu1 %v1198_v16 }
  0x37   :  { %2378 = vmatprep.subr.mxu0 %v2169_v17  ;;  %2416 = vmatprep.subr.mxu1 %v1197_v18 }
  0x38   :  { %2379 = vmatpush3.msra.mxu0 %v2169_v17  ;;  %2417 = vmatpush3.msra.mxu1 %v1197_v18 }
  0x39   :  { %2380 = vmatprep.subr.mxu0 %v2168_v19  ;;  %2418 = vmatprep.subr.mxu1 %v1196_v20 }
  0x3a   :  { %2381 = vmatpush3.msra.mxu0 %v2168_v19  ;;  %2419 = vmatpush3.msra.mxu1 %v1196_v20 }
  0x3b   :  { %2382 = vmatprep.subr.mxu0 %v2167_v21  ;;  %2420 = vmatprep.subr.mxu1 %v1195_v22 }
  0x3c   :  { %2383 = vmatpush3.msra.mxu0 %v2167_v21  ;;  %2421 = vmatpush3.msra.mxu1 %v1195_v22  ;;  %v93_v22 = vld [vmem:[%s3326_s2 + $0x8] sm:$0xff] }
  0x3d   :  { %2384 = vmatprep.subr.mxu0 %v2166_v23  ;;  %2422 = vmatprep.subr.mxu1 %v1194_v24 }
  0x3e   :  { %2385 = vmatpush3.msra.mxu0 %v2166_v23  ;;  %2423 = vmatpush3.msra.mxu1 %v1194_v24 }
  0x3f   :  { %2386 = vmatprep.subr.mxu0 %v2165_v25  ;;  %2424 = vmatprep.subr.mxu1 %v1193_v26 }
  0x40   :  { %2387 = vmatpush3.msra.mxu0 %v2165_v25  ;;  %2425 = vmatpush3.msra.mxu1 %v1193_v26 }
  0x41   :  { %2388 = vmatprep.subr.mxu0 %v2164_v27  ;;  %2426 = vmatprep.subr.mxu1 %v1192_v28 }
  0x42   :  { %2389 = vmatpush3.msra.mxu0 %v2164_v27  ;;  %2427 = vmatpush3.msra.mxu1 %v1192_v28 }
  0x43   :  { %2390 = vmatprep.subr.mxu0 %v2163_v29  ;;  %2428 = vmatprep.subr.mxu1 %v1191_v30 }
  0x44   :  { %2391 = vmatpush3.msra.mxu0 %v2163_v29  ;;  %2429 = vmatpush3.msra.mxu1 %v1191_v30  ;;  %v131_v29 = vrot.slane %v93_v22, %v98_v40  ;;  %v139_v30 = vrot.slane %v93_v22, %v106_v41 }
  0x45   :  { %2392 = vmatprep.subr.mxu0 %v2162_v31  ;;  %2430 = vmatprep.subr.mxu1 %v1190_v32 }
  0x46   :  { %2393 = vmatpush3.msra.mxu0 %v2162_v31  ;;  %2431 = vmatpush3.msra.mxu1 %v1190_v32  ;;  %v135_v31 = vrot.slane %v93_v22, %v102_v44  ;;  %v143_v32 = vrot.slane %v93_v22, %v110_v45 }
  0x47   :  { %2394 = vmatprep.subr.mxu0 %v2161_v33  ;;  %2432 = vmatprep.subr.mxu1 %v1189_v34 }
  0x48   :  { %2395 = vmatpush3.msra.mxu0 %v2161_v33  ;;  %2433 = vmatpush3.msra.mxu1 %v1189_v34 }
  0x49   :  { %2440 = vmatprep.subr.mxu0 %v3024_v35 }
  0xca   :  { %v246_v51 = vpop.f32.mrf.mxu0  ;;  %v317_v52 = vpop.f32.mrf.mxu1 }
  0xcb   :  { %v247_v53 = vadd.f32 %v246_v51, %v99_v46  ;;  %v318_v54 = vadd.f32 %v317_v52, %v107_v47 }
  0xcc   :  { %v248_v55 = vpop.f32.mrf.mxu0  ;;  %v319_v56 = vpop.f32.mrf.mxu1 }
  0xcd   :  { %v759_v59 = vrot.slane %v247_v53, %v3041_v48  ;;  %v813_v60 = vrot.slane %v318_v54, %v3041_v48  ;;  %v249_v61 = vadd.f32 %v248_v55, %v103_v49  ;;  %v320_v62 = vadd.f32 %v319_v56, %v111_v50 }
  0xce   :  { %v147_v54 = vrot.slane %v93_v22, %v114_v57  ;;  %v155_v55 = vrot.slane %v93_v22, %v122_v58  ;;  %v151_v56 = vrot.slane %v93_v22, %v118_v63 }
  0xcf   :  { %v760_v1 = vcombine.high %v759_v59, %v759_v59  ;;  %2129 = vst.sshfl [vmem:[#allocation2 + $0x1] sm:$0x1 pattern:$0x73625140] %v759_v59  ;;  %v814_v2 = vcombine.high %v813_v60, %v813_v60  ;;  %v786_v3 = vrot.slane %v249_v61, %v3041_v48  ;;  %v840_v4 = vrot.slane %v320_v62, %v3041_v48 }
  0xd0   :  { %2133 = vst.sshfl [vmem:[#allocation2 + $0x3] sm:$0x1 pattern:$0x73625140] %v813_v60  ;;  %v159_v59 = vrot.slane %v93_v22, %v126_v0  ;;  %v2184_v22 = vld [vmem:[%s3327_s3 + $0x138] sm:$0xff] }
  0xd1   :  { %2130 = vst.sshfl [vmem:[#allocation2 + $0x19] sm:$0x1 pattern:$0x73625140] %v760_v1  ;;  %v787_v5 = vcombine.high %v786_v3, %v786_v3  ;;  %v841_v7 = vcombine.high %v840_v4, %v840_v4 }
  0xd2   :  { %2134 = vst.sshfl [vmem:[#allocation2 + $0x1b] sm:$0x1 pattern:$0x73625140] %v814_v2 }
  0xd3   :  { %2131 = vst.sshfl [vmem:[#allocation2 + $0x2] sm:$0x1 pattern:$0x73625140] %v786_v3 }
  0xd4   :  { %2135 = vst.sshfl [vmem:[#allocation2 + $0x4] sm:$0x1 pattern:$0x73625140] %v840_v4  ;;  %v388_v12 = vpop.f32.mrf.mxu0  ;;  %v459_v13 = vpop.f32.mrf.mxu1 }
  0xd5   :  { %2132 = vst.sshfl [vmem:[#allocation2 + $0x1a] sm:$0x1 pattern:$0x73625140] %v787_v5  ;;  %v389_v14 = vadd.f32 %v388_v12, %v115_v8  ;;  %v460_v15 = vadd.f32 %v459_v13, %v123_v9  ;;  %v2191_v12 = vld [vmem:[%s3327_s3 + $0x170] sm:$0xff] }
  0xd6   :  { %2136 = vst.sshfl [vmem:[#allocation2 + $0x1c] sm:$0x1 pattern:$0x73625140] %v841_v7  ;;  %v390_v16 = vpop.f32.mrf.mxu0  ;;  %v461_v17 = vpop.f32.mrf.mxu1 }
  0xd7   :  { %v867_v18 = vrot.slane %v389_v14, %v3041_v48  ;;  %v921_v19 = vrot.slane %v460_v15, %v3041_v48  ;;  %v391_v20 = vadd.f32 %v390_v16, %v119_v10  ;;  %v462_v21 = vadd.f32 %v461_v17, %v127_v11  ;;  %v2190_v14 = vld [vmem:[%s3327_s3 + $0x168] sm:$0xff]  ;;  %v2189_v16 = vld [vmem:[%s3327_s3 + $0x160] sm:$0xff] }
  0xd9   :  { %v868_v23 = vcombine.high %v867_v18, %v867_v18  ;;  %2137 = vst.sshfl [vmem:[#allocation2 + $0x5] sm:$0x1 pattern:$0x73625140] %v867_v18  ;;  %v922_v24 = vcombine.high %v921_v19, %v921_v19  ;;  %v894_v25 = vrot.slane %v391_v20, %v3041_v48  ;;  %v948_v26 = vrot.slane %v462_v21, %v3041_v48  ;;  %v2188_v18 = vld [vmem:[%s3327_s3 + $0x158] sm:$0xff]  ;;  %v2186_v20 = vld [vmem:[%s3327_s3 + $0x148] sm:$0xff] }
  0xda   :  { %2141 = vst.sshfl [vmem:[#allocation2 + $0x7] sm:$0x1 pattern:$0x73625140] %v921_v19  ;;  %v2187_v19 = vld [vmem:[%s3327_s3 + $0x150] sm:$0xff]  ;;  %v2185_v21 = vld [vmem:[%s3327_s3 + $0x140] sm:$0xff] }
  0xdb   :  { %2138 = vst.sshfl [vmem:[#allocation2 + $0x1d] sm:$0x1 pattern:$0x73625140] %v868_v23  ;;  %v895_v27 = vcombine.high %v894_v25, %v894_v25  ;;  %v949_v28 = vcombine.high %v948_v26, %v948_v26  ;;  %v2183_v23 = vld [vmem:[%s3327_s3 + $0x130] sm:$0xff] }
  0xdc   :  { %2142 = vst.sshfl [vmem:[#allocation2 + $0x1f] sm:$0x1 pattern:$0x73625140] %v922_v24  ;;  %v2182_v24 = vld [vmem:[%s3327_s3 + $0x128] sm:$0xff] }
  0xdd   :  { %2139 = vst.sshfl [vmem:[#allocation2 + $0x6] sm:$0x1 pattern:$0x73625140] %v894_v25  ;;  %v2181_v25 = vld [vmem:[%s3327_s3 + $0x120] sm:$0xff] }
  0xde   :  { %2143 = vst.sshfl [vmem:[#allocation2 + $0x8] sm:$0x1 pattern:$0x73625140] %v948_v26  ;;  %v530_v33 = vpop.f32.mrf.mxu0  ;;  %v601_v34 = vpop.f32.mrf.mxu1  ;;  %v2180_v26 = vld [vmem:[%s3327_s3 + $0x118] sm:$0xff] }
  0xdf   :  { %2140 = vst.sshfl [vmem:[#allocation2 + $0x1e] sm:$0x1 pattern:$0x73625140] %v895_v27  ;;  %v531_v36 = vadd.f32 %v530_v33, %v131_v29  ;;  %v602_v38 = vadd.f32 %v601_v34, %v139_v30  ;;  %v2179_v27 = vld [vmem:[%s3327_s3 + $0x110] sm:$0xff]  ;;  %v2177_v29 = vld [vmem:[%s3327_s3 + $0x100] sm:$0xff] }
  0xe0   :  { %2144 = vst.sshfl [vmem:[#allocation2 + $0x20] sm:$0x1 pattern:$0x73625140] %v949_v28  ;;  %v532_v39 = vpop.f32.mrf.mxu0  ;;  %v603_v42 = vpop.f32.mrf.mxu1  ;;  %v2178_v28 = vld [vmem:[%s3327_s3 + $0x108] sm:$0xff]  ;;  %v2209_v33 = vld [vmem:[%s3328_s4 + $0xb8] sm:$0xff] }
  0xe1   :  { %v975_v43 = vrot.slane %v531_v36, %v3041_v48  ;;  %v1029_v40 = vrot.slane %v602_v38, %v3041_v48  ;;  %v533_v46 = vadd.f32 %v532_v39, %v135_v31  ;;  %v604_v41 = vadd.f32 %v603_v42, %v143_v32  ;;  %2478 = vmatprep.subr.mxu1 %v2209_v33  ;;  %v2229_v34 = vld [vmem:[%s3328_s4 + $0x118] sm:$0xff]  ;;  %v2208_v36 = vld [vmem:[%s3328_s4 + $0xb0] sm:$0xff]  ;;  %v2207_v39 = vld [vmem:[%s3328_s4 + $0xa8] sm:$0xff] }
  0xe2   :  { %v2228_v38 = vld [vmem:[%s3328_s4 + $0x110] sm:$0xff]  ;;  %v2227_v42 = vld [vmem:[%s3328_s4 + $0x108] sm:$0xff] }
  0xe3   :  { %v976_v50 = vcombine.high %v975_v43, %v975_v43  ;;  %2145 = vst.sshfl [vmem:[#allocation2 + $0x9] sm:$0x1 pattern:$0x73625140] %v975_v43  ;;  %v1030_v44 = vcombine.high %v1029_v40, %v1029_v40  ;;  %v1002_v45 = vrot.slane %v533_v46, %v3041_v48  ;;  %v1056_v51 = vrot.slane %v604_v41, %v3041_v48  ;;  %v2206_v43 = vld [vmem:[%s3328_s4 + $0xa0] sm:$0xff]  ;;  %v2205_v46 = vld [vmem:[%s3328_s4 + $0x98] sm:$0xff] }
  0xe4   :  { %v1185_v49 = vld [vmem:[#allocation2] sm:$0xff]  ;;  %2149 = vst.sshfl [vmem:[#allocation2 + $0xb] sm:$0x1 pattern:$0x73625140] %v1029_v40  ;;  %v2225_v41 = vld [vmem:[%s3328_s4 + $0xf8] sm:$0xff] }
  0xe5   :  { %v1205_v47 = vld [vmem:[#allocation2 + $0x1] sm:$0xff]  ;;  %2434 = vmatprep.mubr.f32.mxu1 %v1185_v49  ;;  %2146 = vst.sshfl [vmem:[#allocation2 + $0x21] sm:$0x1 pattern:$0x73625140] %v976_v50  ;;  %v1003_v52 = vcombine.high %v1002_v45, %v1002_v45  ;;  %v1057_v53 = vcombine.high %v1056_v51, %v1056_v51  ;;  %v2224_v49 = vld [vmem:[%s3328_s4 + $0xf0] sm:$0xff] }
  0xe6   :  { %2396 = vmatprep.mubr.f32.mxu0 %v1205_v47  ;;  %2150 = vst.sshfl [vmem:[#allocation2 + $0x23] sm:$0x1 pattern:$0x73625140] %v1030_v44  ;;  %v2226_v40 = vld [vmem:[%s3328_s4 + $0x100] sm:$0xff]  ;;  %v2204_v47 = vld [vmem:[%s3328_s4 + $0x90] sm:$0xff] }
  0xe7   :  { %2147 = vst.sshfl [vmem:[#allocation2 + $0xa] sm:$0x1 pattern:$0x73625140] %v1002_v45  ;;  %v1207_v13 = vld [vmem:[#allocation2 + $0x19] sm:$0xff]  ;;  %v2203_v50 = vld [vmem:[%s3328_s4 + $0x88] sm:$0xff] }
  0xe8   :  { %2151 = vst.sshfl [vmem:[#allocation2 + $0xc] sm:$0x1 pattern:$0x73625140] %v1056_v51  ;;  %v672_v60 = vpop.f32.mrf.mxu0  ;;  %v743_v61 = vpop.f32.mrf.mxu1  ;;  %v2223_v44 = vld [vmem:[%s3328_s4 + $0xe8] sm:$0xff]  ;;  %v2202_v45 = vld [vmem:[%s3328_s4 + $0x80] sm:$0xff] }
  0xe9   :  { %2148 = vst.sshfl [vmem:[#allocation2 + $0x22] sm:$0x1 pattern:$0x73625140] %v1003_v52  ;;  %v673_v62 = vadd.f32 %v672_v60, %v147_v54  ;;  %v744_v1 = vadd.f32 %v743_v61, %v155_v55  ;;  %v2222_v51 = vld [vmem:[%s3328_s4 + $0xe0] sm:$0xff]  ;;  %v2201_v52 = vld [vmem:[%s3328_s4 + $0x78] sm:$0xff] }
  0xea   :  { %2152 = vst.sshfl [vmem:[#allocation2 + $0x24] sm:$0x1 pattern:$0x73625140] %v1057_v53  ;;  %v674_v2 = vpop.f32.mrf.mxu0  ;;  %v745_v3 = vpop.f32.mrf.mxu1  ;;  %v2221_v53 = vld [vmem:[%s3328_s4 + $0xd8] sm:$0xff]  ;;  %v2200_v54 = vld [vmem:[%s3328_s4 + $0x70] sm:$0xff] }
  0xeb   :  { %v1083_v4 = vrot.slane %v673_v62, %v3041_v48  ;;  %v1137_v57 = vrot.slane %v744_v1, %v3041_v48  ;;  %v675_v5 = vadd.f32 %v674_v2, %v151_v56  ;;  %v746_v58 = vadd.f32 %v745_v3, %v159_v59  ;;  %v2220_v55 = vld [vmem:[%s3328_s4 + $0xd0] sm:$0xff]  ;;  %v2219_v56 = vld [vmem:[%s3328_s4 + $0xc8] sm:$0xff]  ;;  %v2198_v59 = vld [vmem:[%s3328_s4 + $0x60] sm:$0xff] }
  0xec   :  { %v1398_v31 = vld [vmem:[#allocation2 + $0x1a] sm:$0xff] }
  0xed   :  { %v1084_v7 = vcombine.high %v1083_v4, %v1083_v4  ;;  %2153 = vst.sshfl [vmem:[#allocation2 + $0xd] sm:$0x1 pattern:$0x73625140] %v1083_v4  ;;  %v1138_v8 = vcombine.high %v1137_v57, %v1137_v57  ;;  %v1110_v63 = vrot.slane %v675_v5, %v3041_v48  ;;  %v1164_v37 = vrot.slane %v746_v58, %v3041_v48  ;;  %v1187_v48 = vld [vmem:[#allocation2 + $0x18] sm:$0xff]  ;;  %v2218_v60 = vld [vmem:[%s3328_s4 + $0xc0] sm:$0xff] }
  0xee   :  { %2157 = vst.sshfl [vmem:[#allocation2 + $0xf] sm:$0x1 pattern:$0x73625140] %v1137_v57  ;;  %v3219_v61 = vld [vmem:[%s3328_s4 + $0x58] sm:$0xff] }
  0xef   :  { %2154 = vst.sshfl [vmem:[#allocation2 + $0x25] sm:$0x1 pattern:$0x73625140] %v1084_v7  ;;  %v1111_v0 = vcombine.high %v1110_v63, %v1110_v63  ;;  %v1165_v9 = vcombine.high %v1164_v37, %v1164_v37  ;;  %v2193_v7 = vld [vmem:[%s3330_s6] ss:$0 sm:$0xff] }
  0xf0   :  { %2158 = vst.sshfl [vmem:[#allocation2 + $0x27] sm:$0x1 pattern:$0x73625140] %v1138_v8 }
  0xf1   :  { %2155 = vst.sshfl [vmem:[#allocation2 + $0xe] sm:$0x1 pattern:$0x73625140] %v1110_v63 }
  0xf2   :  { %2159 = vst.sshfl [vmem:[#allocation2 + $0x10] sm:$0x1 pattern:$0x73625140] %v1164_v37 }
  0xf3   :  { %2156 = vst.sshfl [vmem:[#allocation2 + $0x26] sm:$0x1 pattern:$0x73625140] %v1111_v0 }
  0xf4   :  { %2160 = vst.sshfl [vmem:[#allocation2 + $0x28] sm:$0x1 pattern:$0x73625140] %v1165_v9 }
  0xf8   :  { %v1186_v11 = vld [vmem:[#allocation2 + $0x8] sm:$0xff] }
  0xf9   :  { %v1206_v10 = vld [vmem:[#allocation2 + $0x9] sm:$0xff]  ;;  %2435 = vmatmul.mubr.f32.vlgmr.msra.gmra.mxu1 %v1186_v11 }
  0xfa   :  { %2397 = vmatmul.mubr.f32.vlgmr.msra.gmra.mxu0 %v1206_v10  ;;  %2437 = vmatprep.mubr.f32.mxu1 %v1187_v48  ;;  %v1188_v17 = vld [vmem:[#allocation2 + $0x20] sm:$0xff]  ;;  %v1397_v30 = vld [vmem:[#allocation2 + $0xa] sm:$0xff] }
  0xfb   :  { %2441 = vmatpush3.msra.mxu0 %v3024_v35  ;;  %2399 = vmatprep.mubr.f32.mxu0 %v1207_v13  ;;  %v1208_v15 = vld [vmem:[#allocation2 + $0x21] sm:$0xff] }
  0xfc   :  { %2442 = vmatprep.subr.mxu0 %v2191_v12  ;;  %v1396_v35 = vld [vmem:[#allocation2 + $0x2] sm:$0xff]  ;;  %2479 = vmatpush3.msra.mxu1 %v2209_v33 }
  0xfd   :  { %2443 = vmatpush3.msra.mxu0 %v2191_v12  ;;  %2438 = vmatmul.mubr.f32.gmra.mxu1 %v1188_v17  ;;  %v1399_v32 = vld [vmem:[#allocation2 + $0x22] sm:$0xff] }
  0xfe   :  { %2444 = vmatprep.subr.mxu0 %v2190_v14  ;;  %2400 = vmatmul.mubr.f32.gmra.mxu0 %v1208_v15 }
  0xff   :  { %2445 = vmatpush3.msra.mxu0 %v2190_v14  ;;  %2472 = vmatprep.mubr.f32.mxu0 %v1396_v35 }
 0x100   :  { %2446 = vmatprep.subr.mxu0 %v2189_v16  ;;  %2480 = vmatprep.subr.mxu1 %v2208_v36 }
 0x101   :  { %2447 = vmatpush3.msra.mxu0 %v2189_v16  ;;  %2481 = vmatpush3.msra.mxu1 %v2208_v36 }
 0x102   :  { %2448 = vmatprep.subr.mxu0 %v2188_v18  ;;  %2482 = vmatprep.subr.mxu1 %v2207_v39 }
 0x103   :  { %2449 = vmatpush3.msra.mxu0 %v2188_v18  ;;  %2483 = vmatpush3.msra.mxu1 %v2207_v39 }
 0x104   :  { %2450 = vmatprep.subr.mxu0 %v2187_v19  ;;  %2484 = vmatprep.subr.mxu1 %v2206_v43 }
 0x105   :  { %2451 = vmatpush3.msra.mxu0 %v2187_v19  ;;  %2485 = vmatpush3.msra.mxu1 %v2206_v43 }
 0x106   :  { %2452 = vmatprep.subr.mxu0 %v2186_v20  ;;  %2486 = vmatprep.subr.mxu1 %v2205_v46 }
 0x107   :  { %2453 = vmatpush3.msra.mxu0 %v2186_v20  ;;  %2487 = vmatpush3.msra.mxu1 %v2205_v46 }
 0x108   :  { %2454 = vmatprep.subr.mxu0 %v2185_v21  ;;  %2488 = vmatprep.subr.mxu1 %v2204_v47 }
 0x109   :  { %2455 = vmatpush3.msra.mxu0 %v2185_v21  ;;  %2489 = vmatpush3.msra.mxu1 %v2204_v47  ;;  %v1567_v47 = vld [vmem:[%s3328_s4 + $0x50] sm:$0xff] }
 0x10a   :  { %2456 = vmatprep.subr.mxu0 %v2184_v22  ;;  %2490 = vmatprep.subr.mxu1 %v2203_v50 }
 0x10b   :  { %2457 = vmatpush3.msra.mxu0 %v2184_v22  ;;  %2491 = vmatpush3.msra.mxu1 %v2203_v50 }
 0x10c   :  { %2458 = vmatprep.subr.mxu0 %v2183_v23  ;;  %2492 = vmatprep.subr.mxu1 %v2202_v45 }
 0x10d   :  { %2459 = vmatpush3.msra.mxu0 %v2183_v23  ;;  %2493 = vmatpush3.msra.mxu1 %v2202_v45 }
 0x10e   :  { %2460 = vmatprep.subr.mxu0 %v2182_v24  ;;  %2494 = vmatprep.subr.mxu1 %v2201_v52 }
 0x10f   :  { %2461 = vmatpush3.msra.mxu0 %v2182_v24  ;;  %2495 = vmatpush3.msra.mxu1 %v2201_v52  ;;  %v1565_v52 = vld [vmem:[%s3328_s4 + $0x40] sm:$0xff] }
 0x110   :  { %2462 = vmatprep.subr.mxu0 %v2181_v25  ;;  %2496 = vmatprep.subr.mxu1 %v2200_v54 }
 0x111   :  { %2463 = vmatpush3.msra.mxu0 %v2181_v25  ;;  %2497 = vmatpush3.msra.mxu1 %v2200_v54  ;;  %v1564_v54 = vld [vmem:[%s3328_s4 + $0x38] sm:$0xff] }
 0x112   :  { %2464 = vmatprep.subr.mxu0 %v2180_v26  ;;  %2498 = vmatprep.subr.mxu1 %v2199_v6 }
 0x113   :  { %2465 = vmatpush3.msra.mxu0 %v2180_v26  ;;  %2499 = vmatpush3.msra.mxu1 %v2199_v6  ;;  %v1562_v6 = vld [vmem:[%s3328_s4 + $0x28] sm:$0xff] }
 0x114   :  { %2466 = vmatprep.subr.mxu0 %v2179_v27  ;;  %2500 = vmatprep.subr.mxu1 %v2198_v59 }
 0x115   :  { %2467 = vmatpush3.msra.mxu0 %v2179_v27  ;;  %2501 = vmatpush3.msra.mxu1 %v2198_v59  ;;  %v1560_v59 = vld [vmem:[%s3328_s4 + $0x18] sm:$0xff] }
 0x116   :  { %2468 = vmatprep.subr.mxu0 %v2178_v28  ;;  %2508 = vmatprep.subr.mxu1 %v3219_v61 }
 0x117   :  { %2469 = vmatpush3.msra.mxu0 %v2178_v28 }
 0x118   :  { %2470 = vmatprep.subr.mxu0 %v2177_v29 }
 0x119   :  { %2471 = vmatpush3.msra.mxu0 %v2177_v29 }
 0x11a   :  { %2473 = vmatmul.mubr.f32.vlgmr.msra.gmra.mxu0 %v1397_v30  ;;  %2538 = vmatprep.subr.mxu0 %v2229_v34 }
 0x11b   :  { %2475 = vmatprep.mubr.f32.mxu0 %v1398_v31  ;;  %2539 = vmatpush3.msra.mxu0 %v2229_v34 }
 0x11c   :  { %2540 = vmatprep.subr.mxu0 %v2228_v38 }
 0x11d   :  { %2541 = vmatpush3.msra.mxu0 %v2228_v38 }
 0x11e   :  { %2476 = vmatmul.mubr.f32.gmra.mxu0 %v1399_v32  ;;  %2542 = vmatprep.subr.mxu0 %v2227_v42 }
 0x11f   :  { %2543 = vmatpush3.msra.mxu0 %v2227_v42 }
 0x120   :  { %2544 = vmatprep.subr.mxu0 %v2226_v40 }
 0x121   :  { %2545 = vmatpush3.msra.mxu0 %v2226_v40 }
 0x122   :  { %2546 = vmatprep.subr.mxu0 %v2225_v41 }
 0x123   :  { %2547 = vmatpush3.msra.mxu0 %v2225_v41 }
 0x124   :  { %2548 = vmatprep.subr.mxu0 %v2224_v49 }
 0x125   :  { %2549 = vmatpush3.msra.mxu0 %v2224_v49  ;;  %v1566_v49 = vld [vmem:[%s3328_s4 + $0x48] sm:$0xff] }
 0x126   :  { %2550 = vmatprep.subr.mxu0 %v2223_v44 }
 0x127   :  { %2551 = vmatpush3.msra.mxu0 %v2223_v44 }
 0x128   :  { %2552 = vmatprep.subr.mxu0 %v2222_v51 }
 0x129   :  { %2553 = vmatpush3.msra.mxu0 %v2222_v51 }
 0x12a   :  { %2554 = vmatprep.subr.mxu0 %v2221_v53 }
 0x12b   :  { %2555 = vmatpush3.msra.mxu0 %v2221_v53 }
 0x12c   :  { %2556 = vmatprep.subr.mxu0 %v2220_v55 }
 0x12d   :  { %2557 = vmatpush3.msra.mxu0 %v2220_v55  ;;  %v1563_v55 = vld [vmem:[%s3328_s4 + $0x30] sm:$0xff] }
 0x12e   :  { %2558 = vmatprep.subr.mxu0 %v2219_v56 }
 0x12f   :  { %2559 = vmatpush3.msra.mxu0 %v2219_v56  ;;  %v1561_v56 = vld [vmem:[%s3328_s4 + $0x20] sm:$0xff] }
 0x130   :  { %2560 = vmatprep.subr.mxu0 %v2218_v60 }
 0x131   :  { %2561 = vmatpush3.msra.mxu0 %v2218_v60  ;;  %v1559_v60 = vld [vmem:[%s3328_s4 + $0x10] sm:$0xff] }
 0x1b9   :  { %v2436_v1 = vpop.f32.mrf.mxu1 }
 0x1ba   :  { %v2398_v62 = vpop.f32.mrf.mxu0 }
 0x1bb   :  { %v1377_v3 = vpop.f32.mrf.mxu1  ;;  %v1383_v58 = vadd.f32 %v2436_v1, %v2398_v62  ;;  %v1557_v62 = vld [vmem:[%s3328_s4] sm:$0xff] }
 0x1bc   :  { %v1292_v2 = vpop.f32.mrf.mxu0 }
 0x1bd   :  { %v2439_v57 = vpop.f32.mrf.mxu1  ;;  %v1378_v63 = vadd.f32 %v1377_v3, %v1292_v2 }
 0x1be   :  { %v2401_v4 = vpop.f32.mrf.mxu0 }
 0x1bf   :  { %v1387_v0 = vpop.f32.mrf.mxu1  ;;  %v1393_v10 = vadd.f32 %v2439_v57, %v2401_v4  ;;  %v1942_v4 = vld [vmem:[%s3329_s5 + $0x38] sm:$0xff]  ;;  %v1941_v57 = vld [vmem:[%s3329_s5 + $0x30] sm:$0xff] }
 0x1c0   :  { %v1302_v5 = vpop.f32.mrf.mxu0 }
 0x1c1   :  { %v1388_v48 = vadd.f32 %v1387_v0, %v1302_v5  ;;  %v1940_v5 = vld [vmem:[%s3329_s5 + $0x28] sm:$0xff] }
 0x1da   :  { %v2474_v8 = vpop.f32.mrf.mxu0 }
 0x1db   :  { %v1503_v37 = vadd.f32 %v2474_v8, %v1383_v58  ;;  %v1939_v58 = vld [vmem:[%s3329_s5 + $0x20] sm:$0xff]  ;;  %v1937_v8 = vld [vmem:[%s3329_s5 + $0x10] sm:$0xff] }
 0x1dc   :  { %v1483_v9 = vpop.f32.mrf.mxu0 }
 0x1dd   :  { %v1511_v11 = vadd.f32 %v2193_v7, %v1503_v37  ;;  %v1502_v12 = vadd.f32 %v1483_v9, %v1378_v63  ;;  %v1936_v63 = vld [vmem:[%s3329_s5 + $0x8] sm:$0xff]  ;;  %v1935_v37 = vld [vmem:[%s3329_s5] sm:$0xff] }
 0x1de   :  { %v2477_v13 = vpop.f32.mrf.mxu0 }
 0x1df   :  { %v2195_v14 = vmul.f32 -1.442695, %v1511_v11  ;;  %v1510_v15 = vadd.f32 %v2193_v7, %v1502_v12  ;;  %v1505_v16 = vadd.f32 %v2477_v13, %v1393_v10 }
 0x1e0   :  { %v1493_v17 = vpop.f32.mrf.mxu0 }
 0x1e1   :  { %2598 = vpow2.f32 %v2195_v14  ;;  %v2194_v35 = vmul.f32 -1.442695, %v1510_v15  ;;  %v1513_v18 = vadd.f32 %v2193_v7, %v1505_v16  ;;  %v1504_v19 = vadd.f32 %v1493_v17, %v1388_v48 }
 0x1e3   :  { %2600 = vpow2.f32 %v2194_v35  ;;  %v2197_v20 = vmul.f32 -1.442695, %v1513_v18  ;;  %v1512_v21 = vadd.f32 %v2193_v7, %v1504_v19  ;;  %v1938_v7 = vld [vmem:[%s3329_s5 + $0x18] sm:$0xff] }
 0x1e5   :  { %2602 = vpow2.f32 %v2197_v20  ;;  %v2196_v22 = vmul.f32 -1.442695, %v1512_v21 }
 0x1e7   :  { %2604 = vpow2.f32 %v2196_v22 }
 0x1ee   :  { %v2599_v23 = vpop.eup %2598 }
 0x1ef   :  { %v1527_v24 = vadd.f32 1.0, %v2599_v23 }
 0x1f0   :  { %v2601_v25 = vpop.eup %2600 }
 0x1f1   :  { %2606 = vrcp.f32 %v1527_v24  ;;  %v1526_v26 = vadd.f32 1.0, %v2601_v25 }
 0x1f2   :  { %v2603_v27 = vpop.eup %2602 }
 0x1f3   :  { %2608 = vrcp.f32 %v1526_v26  ;;  %v1529_v28 = vadd.f32 1.0, %v2603_v27 }
 0x1f4   :  { %v2605_v29 = vpop.eup %2604 }
 0x1f5   :  { %2610 = vrcp.f32 %v1529_v28  ;;  %v1528_v30 = vadd.f32 1.0, %v2605_v29 }
 0x1f7   :  { %2612 = vrcp.f32 %v1528_v30 }
 0x1fe   :  { %v2607_v31 = vpop.eup %2606 }
 0x1ff   :  { %v1539_v32 = vmul.f32 %v2607_v31, %v1511_v11 }
 0x200   :  { %v2609_v33 = vpop.eup %2608 }
 0x201   :  { %1549 = vst.msk [vmem:[#allocation3 + $0x9] sm:$0xff] %vm1547_vm2, %v1539_v32  ;;  %v1538_v34 = vmul.f32 %v2609_v33, %v1510_v15  ;;  %v2234_v15 = vld [vmem:[%s3330_s6 + $0x1] ss:$0 sm:$0xff] }
 0x202   :  { %v2611_v36 = vpop.eup %2610 }
 0x203   :  { %1548 = vst.msk [vmem:[#allocation3 + $0x1] sm:$0xff] %vm1547_vm2, %v1538_v34  ;;  %v1541_v38 = vmul.f32 %v2611_v36, %v1513_v18 }
 0x204   :  { %v2613_v39 = vpop.eup %2612 }
 0x205   :  { %1551 = vst.msk [vmem:[#allocation3 + $0x21] sm:$0xff] %vm1547_vm2, %v1541_v38  ;;  %v1540_v42 = vmul.f32 %v2613_v39, %v1512_v21 }
 0x207   :  { %1550 = vst.msk [vmem:[#allocation3 + $0x19] sm:$0xff] %vm1547_vm2, %v1540_v42 }
 0x208   :  { %v1570_v46 = vld [vmem:[#allocation3 + $0x9] sm:$0xff] }
 0x209   :  { %v1781_v41 = vld [vmem:[#allocation3 + $0xa] sm:$0xff] }
 0x20a   :  { %v1569_v43 = vld [vmem:[#allocation3 + $0x1] sm:$0xff] }
 0x20b   :  { %v1780_v40 = vld [vmem:[#allocation3 + $0x2] sm:$0xff]  ;;  %2502 = vmatprep.mubr.msk.f32.mxu1 %vm1547_vm2, %v1569_v43 }
 0x20c   :  { %2562 = vmatprep.mubr.msk.f32.mxu0 %vm1547_vm2, %v1780_v40  ;;  %2503 = vmatmul.mubr.msk.f32.vlgmr.msra.gmra.mxu1 %vm1547_vm2, %v1570_v46  ;;  %v1572_v45 = vld [vmem:[#allocation3 + $0x21] sm:$0xff] }
 0x20d   :  { %2563 = vmatmul.mubr.msk.f32.vlgmr.msra.gmra.mxu0 %vm1547_vm2, %v1781_v41  ;;  %2509 = vmatpush3.msra.mxu1 %v3219_v61  ;;  %v1783_v51 = vld [vmem:[#allocation3 + $0x22] sm:$0xff]  ;;  %v1558_v61 = vld [vmem:[%s3328_s4 + $0x8] sm:$0xff] }
 0x20e   :  { %2510 = vmatprep.subr.mxu1 %v1567_v47  ;;  %v1571_v50 = vld [vmem:[#allocation3 + $0x19] sm:$0xff]  ;;  %v1554_v1 = vld [vmem:[#allocation3 + $0x8] sm:$0xff] }
 0x20f   :  { %v1782_v44 = vld [vmem:[#allocation3 + $0x1a] sm:$0xff]  ;;  %2511 = vmatpush3.msra.mxu1 %v1567_v47  ;;  %2505 = vmatprep.mubr.msk.f32.mxu1 %vm1547_vm2, %v1571_v50 }
 0x210   :  { %2512 = vmatprep.subr.mxu1 %v1566_v49  ;;  %2565 = vmatprep.mubr.msk.f32.mxu0 %vm1547_vm2, %v1782_v44  ;;  %v1553_v53 = vld [vmem:[#allocation3] sm:$0xff]  ;;  %v1555_v2 = vld [vmem:[#allocation3 + $0x18] sm:$0xff] }
 0x211   :  { %2506 = vmatmul.mubr.msk.f32.gmra.mxu1 %vm1547_vm2, %v1572_v45  ;;  %2566 = vmatmul.mubr.msk.f32.gmra.mxu0 %vm1547_vm2, %v1783_v51  ;;  %v1556_v3 = vld [vmem:[#allocation3 + $0x20] sm:$0xff] }
 0x212   :  { %2513 = vmatpush3.msra.mxu1 %v1566_v49  ;;  %2532 = vmatprep.mubr.msk.f32.mxu1 %vm1547_vm2, %v1553_v53 }
 0x213   :  { %2514 = vmatprep.subr.mxu1 %v1565_v52 }
 0x214   :  { %2515 = vmatpush3.msra.mxu1 %v1565_v52 }
 0x215   :  { %2516 = vmatprep.subr.mxu1 %v1564_v54 }
 0x216   :  { %2517 = vmatpush3.msra.mxu1 %v1564_v54  ;;  %v2239_v54 = vld [vmem:[%s3330_s6 + $0x2] ss:$0 sm:$0xff]  ;;  %s2656_s6 = smov 80  }
 0x217   :  { %2518 = vmatprep.subr.mxu1 %v1563_v55 }
 0x218   :  { %2519 = vmatpush3.msra.mxu1 %v1563_v55 }
 0x219   :  { %2520 = vmatprep.subr.mxu1 %v1562_v6 }
 0x21a   :  { %2521 = vmatpush3.msra.mxu1 %v1562_v6 }
 0x21b   :  { %2522 = vmatprep.subr.mxu1 %v1561_v56 }
 0x21c   :  { %2523 = vmatpush3.msra.mxu1 %v1561_v56 }
 0x21d   :  { %2524 = vmatprep.subr.mxu1 %v1560_v59 }
 0x21e   :  { %2525 = vmatpush3.msra.mxu1 %v1560_v59 }
 0x21f   :  { %2526 = vmatprep.subr.mxu1 %v1559_v60 }
 0x220   :  { %2527 = vmatpush3.msra.mxu1 %v1559_v60 }
 0x221   :  { %2528 = vmatprep.subr.mxu1 %v1558_v61 }
 0x222   :  { %2529 = vmatpush3.msra.mxu1 %v1558_v61 }
 0x223   :  { %2530 = vmatprep.subr.mxu1 %v1557_v62 }
 0x224   :  { %2531 = vmatpush3.msra.mxu1 %v1557_v62 }
 0x225   :  { %2533 = vmatmul.mubr.msk.f32.vlgmr.msra.gmra.mxu1 %vm1547_vm2, %v1554_v1  ;;  %2568 = vmatprep.subr.mxu1 %v1942_v4 }
 0x226   :  { %2535 = vmatprep.mubr.msk.f32.mxu1 %vm1547_vm2, %v1555_v2  ;;  %2569 = vmatpush3.msra.mxu1 %v1942_v4 }
 0x227   :  { %2570 = vmatprep.subr.mxu1 %v1941_v57 }
 0x228   :  { %2571 = vmatpush3.msra.mxu1 %v1941_v57 }
 0x229   :  { %2536 = vmatmul.mubr.msk.f32.gmra.mxu1 %vm1547_vm2, %v1556_v3  ;;  %2572 = vmatprep.subr.mxu1 %v1940_v5 }
 0x22a   :  { %2573 = vmatpush3.msra.mxu1 %v1940_v5 }
 0x22b   :  { %2574 = vmatprep.subr.mxu1 %v1939_v58 }
 0x22c   :  { %2575 = vmatpush3.msra.mxu1 %v1939_v58 }
 0x22d   :  { %2576 = vmatprep.subr.mxu1 %v1938_v7 }
 0x22e   :  { %2577 = vmatpush3.msra.mxu1 %v1938_v7 }
 0x22f   :  { %2578 = vmatprep.subr.mxu1 %v1937_v8 }
 0x230   :  { %2579 = vmatpush3.msra.mxu1 %v1937_v8 }
 0x231   :  { %2580 = vmatprep.subr.mxu1 %v1936_v63 }
 0x232   :  { %2581 = vmatpush3.msra.mxu1 %v1936_v63 }
 0x233   :  { %2582 = vmatprep.subr.mxu1 %v1935_v37 }
 0x234   :  { %2583 = vmatpush3.msra.mxu1 %v1935_v37 }
 0x2cc   :  { %v2504_v0 = vpop.f32.mrf.mxu1 }
 0x2cd   :  { %v2564_v11 = vpop.f32.mrf.mxu0 }
 0x2ce   :  { %v1664_v9 = vpop.f32.mrf.mxu1 }
 0x2cf   :  { %v1875_v13 = vpop.f32.mrf.mxu0 }
 0x2d1   :  { %v2507_v10 = vpop.f32.mrf.mxu1  ;;  %v2567_v18 = vpop.f32.mrf.mxu0 }
 0x2d3   :  { %v1674_v12 = vpop.f32.mrf.mxu1  ;;  %v1885_v28 = vpop.f32.mrf.mxu0 }
 0x2e5   :  { %v2534_v48 = vpop.f32.mrf.mxu1 }
 0x2e6   :  { %v1767_v14 = vadd.f32 %v2534_v48, %v2504_v0 }
 0x2e7   :  { %v1761_v16 = vpop.f32.mrf.mxu1 }
 0x2e8   :  { %v1895_v17 = vadd.f32 %v2564_v11, %v1767_v14  ;;  %v1762_v35 = vadd.f32 %v1761_v16, %v1664_v9 }
 0x2e9   :  { %v2537_v19 = vpop.f32.mrf.mxu1 }
 0x2ea   :  { %v1903_v20 = vadd.f32 %v2234_v15, %v1895_v17  ;;  %v1894_v21 = vadd.f32 %v1875_v13, %v1762_v35  ;;  %v1777_v22 = vadd.f32 %v2537_v19, %v2507_v10 }
 0x2eb   :  { %v1771_v23 = vpop.f32.mrf.mxu1 }
 0x2ec   :  { %v2236_v24 = vmul.f32 -1.442695, %v1903_v20  ;;  %v1902_v25 = vadd.f32 %v2234_v15, %v1894_v21  ;;  %v1897_v26 = vadd.f32 %v2567_v18, %v1777_v22  ;;  %v1772_v27 = vadd.f32 %v1771_v23, %v1674_v12 }
 0x2ee   :  { %2614 = vpow2.f32 %v2236_v24  ;;  %v2235_v29 = vmul.f32 -1.442695, %v1902_v25  ;;  %v1905_v30 = vadd.f32 %v2234_v15, %v1897_v26  ;;  %v1896_v31 = vadd.f32 %v1885_v28, %v1772_v27 }
 0x2f0   :  { %2616 = vpow2.f32 %v2235_v29  ;;  %v2238_v32 = vmul.f32 -1.442695, %v1905_v30  ;;  %v1904_v33 = vadd.f32 %v2234_v15, %v1896_v31 }
 0x2f2   :  { %2618 = vpow2.f32 %v2238_v32  ;;  %v2237_v34 = vmul.f32 -1.442695, %v1904_v33 }
 0x2f4   :  { %2620 = vpow2.f32 %v2237_v34 }
 0x2fb   :  { %v2615_v36 = vpop.eup %2614 }
 0x2fc   :  { %v1919_v38 = vadd.f32 1.0, %v2615_v36 }
 0x2fd   :  { %v2617_v39 = vpop.eup %2616 }
 0x2fe   :  { %v1918_v42 = vadd.f32 1.0, %v2617_v39  ;;  %2622 = vrcp.f32 %v1919_v38 }
 0x2ff   :  { %v2619_v43 = vpop.eup %2618 }
 0x300   :  { %2624 = vrcp.f32 %v1918_v42  ;;  %v1921_v40 = vadd.f32 1.0, %v2619_v43 }
 0x301   :  { %v2621_v46 = vpop.eup %2620 }
 0x302   :  { %v1920_v41 = vadd.f32 1.0, %v2621_v46  ;;  %2626 = vrcp.f32 %v1921_v40 }
 0x304   :  { %2628 = vrcp.f32 %v1920_v41 }
 0x30b   :  { %v2623_v47 = vpop.eup %2622 }
 0x30c   :  { %v1931_v44 = vmul.f32 %v2623_v47, %v1903_v20 }
 0x30d   :  { %v2625_v49 = vpop.eup %2624 }
 0x30e   :  { %v1930_v50 = vmul.f32 %v2625_v49, %v1902_v25 }
 0x30f   :  { %v2627_v45 = vpop.eup %2626 }
 0x310   :  { %2584 = vmatprep.mubr.msk.f32.mxu1 %vm1947_vm3, %v1930_v50  ;;  %v1933_v53 = vmul.f32 %v2627_v45, %v1905_v30 }
 0x311   :  { %v2629_v51 = vpop.eup %2628  ;;  %2585 = vmatmul.mubr.msk.f32.vlgmr.msra.gmra.mxu1 %vm1947_vm3, %v1931_v44 }
 0x312   :  { %v1932_v52 = vmul.f32 %v2629_v51, %v1904_v33 }
 0x314   :  { %2587 = vmatprep.mubr.msk.f32.mxu1 %vm1947_vm3, %v1932_v52 }
 0x315   :  { %2588 = vmatmul.mubr.msk.f32.gmra.mxu1 %vm1947_vm3, %v1933_v53 }
 0x3d1   :  { %v2586_v55 = vpop.f32.mrf.mxu1 }
 0x3d2   :  { %v2032_v6 = vadd.f32 %v2586_v55, %v2239_v54 }
 0x3d3   :  { %v2026_v56 = vpop.f32.mrf.mxu1 }
 0x3d4   :  { %2047 = vst.msk [vmem:[#allocation4 + $0x8] sm:$0xff] %vm2045_vm4, %v2032_v6  ;;  %v2027_v59 = vadd.f32 %v2239_v54, %v2026_v56  ;;  %2073 = vrot.lane.b32.xlu1 %v2032_v6, %s2654_s18  ;;  %2056 = vrot.lane.b32.xlu0 %v2032_v6, %s2655_s19 }
 0x3d5   :  { %v2589_v60 = vpop.f32.mrf.mxu1 }
 0x3d6   :  { %2046 = vst.msk [vmem:[#allocation4] sm:$0xff] %vm2045_vm4, %v2027_v59  ;;  %v2042_v61 = vadd.f32 %v2589_v60, %v2239_v54 }
 0x3d7   :  { %v2036_v62 = vpop.f32.mrf.mxu1 }
 0x3d8   :  { %2049 = vst.msk [vmem:[#allocation4 + $0x48] sm:$0xff] %vm2045_vm4, %v2042_v61  ;;  %v2037_v1 = vadd.f32 %v2239_v54, %v2036_v62  ;;  %2090 = vrot.lane.b32.xlu1 %v2032_v6, %s2656_s6  ;;  %2054 = vrot.lane.b32.xlu0 %v2027_v59, %s2655_s19 }
 0x3da   :  { %2048 = vst.msk [vmem:[#allocation4 + $0x40] sm:$0xff] %vm2045_vm4, %v2037_v1 }
 0x3dc   :  { %2071 = vrot.lane.b32.xlu0 %v2027_v59, %s2654_s18  ;;  %2060 = vrot.lane.b32.xlu1 %v2042_v61, %s2655_s19 }
 0x3e0   :  { %2088 = vrot.lane.b32.xlu0 %v2027_v59, %s2656_s6  ;;  %2077 = vrot.lane.b32.xlu1 %v2042_v61, %s2654_s18 }
 0x3e4   :  { %2075 = vrot.lane.b32.xlu0 %v2037_v1, %s2654_s18  ;;  %2058 = vrot.lane.b32.xlu1 %v2037_v1, %s2655_s19 }
 0x3e8   :  { %2092 = vrot.lane.b32.xlu0 %v2037_v1, %s2656_s6  ;;  %2094 = vrot.lane.b32.xlu1 %v2042_v61, %s2656_s6 }
 0x446   :  { %v2074_v2 = vpop.permute.xlu1 %2073  ;;  %v2057_v3 = vpop.permute.xlu0 %2056 }
 0x447   :  { %2085 = vst.msk [vmem:[#allocation4 + $0x28] sm:$0xff] %vm2045_vm4, %v2074_v2  ;;  %2068 = vst.msk [vmem:[#allocation4 + $0x18] sm:$0xff] %vm2045_vm4, %v2057_v3 }
 0x44a   :  { %v2091_v4 = vpop.permute.xlu1 %2090  ;;  %v2055_v57 = vpop.permute.xlu0 %2054 }
 0x44b   :  { %2102 = vst.msk [vmem:[#allocation4 + $0x38] sm:$0xff] %vm2045_vm4, %v2091_v4  ;;  %2067 = vst.msk [vmem:[#allocation4 + $0x10] sm:$0xff] %vm2045_vm4, %v2055_v57 }
 0x44e   :  { %v2072_v5 = vpop.permute.xlu0 %2071  ;;  %v2061_v58 = vpop.permute.xlu1 %2060 }
 0x44f   :  { %2084 = vst.msk [vmem:[#allocation4 + $0x20] sm:$0xff] %vm2045_vm4, %v2072_v5  ;;  %2070 = vst.msk [vmem:[#allocation4 + $0x58] sm:$0xff] %vm2045_vm4, %v2061_v58 }
 0x452   :  { %v2089_v7 = vpop.permute.xlu0 %2088  ;;  %v2078_v8 = vpop.permute.xlu1 %2077 }
 0x453   :  { %2101 = vst.msk [vmem:[#allocation4 + $0x30] sm:$0xff] %vm2045_vm4, %v2089_v7  ;;  %2087 = vst.msk [vmem:[#allocation4 + $0x68] sm:$0xff] %vm2045_vm4, %v2078_v8 }
 0x456   :  { %v2076_v63 = vpop.permute.xlu0 %2075  ;;  %v2059_v37 = vpop.permute.xlu1 %2058 }
 0x457   :  { %2086 = vst.msk [vmem:[#allocation4 + $0x60] sm:$0xff] %vm2045_vm4, %v2076_v63  ;;  %2069 = vst.msk [vmem:[#allocation4 + $0x50] sm:$0xff] %vm2045_vm4, %v2059_v37 }
 0x45a   :  { %v2093_v0 = vpop.permute.xlu0 %2092  ;;  %v2095_v9 = vpop.permute.xlu1 %2094 }
 0x45b   :  { %2103 = vst.msk [vmem:[#allocation4 + $0x70] sm:$0xff] %vm2045_vm4, %v2093_v0  ;;  %2104 = vst.msk [vmem:[#allocation4 + $0x78] sm:$0xff] %vm2045_vm4, %v2095_v9 }
 0x45c   :  { %2641 = shalt.err (!%p2638_p4)
}
 0x45d   :  { %s2658_s23 = smov 128   ;;  %s2659_s24 = smov 8  }
 0x45e   :  { %2116 = dma.vmem_to_hbm [thread:$0]  %s2111_s21, 2048, %s3331_s7, [#allocation5], %s2658_s23, %s2658_s23, %s2659_s24  }
 0x45f   :  { %2650 = dma.done.wait [#allocation5], 2048  }
 0x460   :  { %2651 = vsyncadd [#allocation5], 4294965248 }
 0x461   :  { %2120 = vsyncpa [#allocation5], 1 }

</bundles_post_ra>
